<compile_context>
chip_gen: v5e
topology: v5e:2x2
jax: 0.10.0
libtpu: 0.0.40
codegen_flags: <defaults>
</compile_context>

<pallas_src>
import functools

import jax
import jax.numpy as jnp
from jax.experimental import pallas as pl
from jax.experimental.pallas import tpu as pltpu

_INV_SQRT2 = 0.7071067811865476
_SQRT_2_OVER_PI = 0.7978845608028654
_VMEM_LIMIT = 32 * 1024 * 1024


def _gelu(x, approx):
    if approx:
        # tanh-approximate GELU: transcendental goes to the EUP slot instead of
        # a long VPU erf polynomial.
        return 0.5 * x * (1.0 + jnp.tanh(_SQRT_2_OVER_PI * (x + 0.044715 * (x * x * x))))
    # Exact (erf-based) GELU, matching torch.nn.GELU() default.
    return 0.5 * x * (1.0 + jax.lax.erf(x * _INV_SQRT2))


def _layernorm(x, gamma, beta, eps):
    x = x.astype(jnp.float32)
    mu = jnp.mean(x, axis=-1, keepdims=True)
    xc = x - mu
    var = jnp.mean(xc * xc, axis=-1, keepdims=True)   # biased variance (torch LN)
    return xc * jax.lax.rsqrt(var + eps) * gamma + beta


# ------------- phase 1: LN -> full W1 -> GELU; stash z_local; sum z_global -------------
def _phase1_kernel(x_ref, gamma_ref, beta_ref, w1_ref, b1_ref,
                   zl_ref, zg_ref,
                   *, eps, cdt, h2, tn, nt_inner, n_valid, mask_tokens, gelu_approx):
    t = pl.program_id(2)

    @pl.when(t == 0)
    def _init():
        zg_ref[...] = jnp.zeros_like(zg_ref)

    xn = _layernorm(x_ref[0], gamma_ref[...], beta_ref[...], eps)           # (TN, C) f32
    z = _gelu(jnp.dot(xn.astype(cdt), w1_ref[...],
                      preferred_element_type=jnp.float32) + b1_ref[...],
              gelu_approx)                                                  # (TN, h) f32

    # Local half goes straight to HBM for phase 2 (x is never read again).
    zl_ref[0] = z[:, :h2].astype(zl_ref.dtype)

    # Global half: masked (padded tokens excluded) per-batch token sum.
    z_global = z[:, h2:]
    if mask_tokens:
        tile = pl.program_id(1) * nt_inner + t
        row = jax.lax.broadcasted_iota(jnp.int32, (tn, 1), 0) + tile * tn
        z_global = jnp.where(row < n_valid, z_global, 0.0)
    zg_ref[0, 0] = zg_ref[0, 0] + jnp.sum(z_global, axis=0, keepdims=True)  # (1, h2)


# ------------------------- phase 2: layer2 on stashed z_local -------------------------
def _phase2_kernel(zl_ref, g_ref, w2l_ref, w3_ref, b3_ref, w4r_ref, b4_ref,
                   out_ref, *, cdt, gelu_approx):
    z_local = zl_ref[0]                                                     # (TN, h2) cdt
    # g already contains mean(z_global) @ W2[h2:, :] + b2 (fused, per batch).
    h1 = _gelu(jnp.dot(z_local, w2l_ref[...],
                       preferred_element_type=jnp.float32) + g_ref[0],
               gelu_approx)                                                 # (TN, h2)
    hh = _gelu(jnp.dot(h1.astype(cdt), w3_ref[...],
                       preferred_element_type=jnp.float32) + b3_ref[...],
               gelu_approx)                                                 # (TN, h4)

    # Final width-1 projection, lane-dense: (1,h4) x (TN,h4)^T -> (1,TN).
    o = jax.lax.dot_general(w4r_ref[...], hh.astype(cdt),
                            dimension_numbers=(((1,), (1,)), ((), ())),
                            preferred_element_type=jnp.float32)
    out_ref[0] = (o + b4_ref[...]).astype(out_ref.dtype)


def _full(shape):
    return pl.BlockSpec(shape, lambda *_: (0,) * len(shape))


def _round_up(n, m):
    return ((n + m - 1) // m) * m


def _pick_token_tile(n):
    n128 = _round_up(n, 128)
    for tn in (1024, 512, 256, 128):
        if n128 % tn == 0:
            return tn
    return 128


def mask_predictor(x, params, *, h_dim, eps=1e-5, matmul_dtype=jnp.bfloat16,
                   gelu_approx=True, token_tile=None):
    """x: (B, N, in_dim). Returns (B, N, 1), matching MaskPredictor.forward."""
    gamma, beta, w1, b1, w2, b2, w3, b3, w4, b4 = params
    B, N, in_dim = x.shape
    h2, h4 = h_dim // 2, h_dim // 4
    cdt = matmul_dtype

    TN = token_tile if token_tile is not None else _pick_token_tile(N)
    N_pad = _round_up(N, TN)
    NT = N_pad // TN
    mask_tokens = (N_pad != N)

    # Split the phase-1 token reduction into 2 parallel halves when possible so
    # both v7x TensorCores have work even at B=1 (no effect on v5e/v6e).
    n_split = 2 if (NT % 2 == 0 and NT >= 2) else 1
    nt_inner = NT // n_split

    # Cast x once at the boundary (halves the dominant HBM read for bf16) and
    # zero-pad the token axis to the tile; padded tokens are masked in-kernel.
    x_p = x.astype(cdt)
    if mask_tokens:
        x_p = jnp.pad(x_p, ((0, 0), (0, N_pad - N), (0, 0)))

    # Split / reshape / cast weights once in the wrapper.
    w1c = w1.astype(cdt)                       # full-width layer-1 matmul
    w2l = w2[:h2, :].astype(cdt)
    w2g = w2[h2:, :].astype(jnp.float32)       # used only in the tiny wrapper matmul
    w3c = w3.astype(cdt)
    w4r = w4.reshape(1, h4).astype(cdt)        # row layout -> lane-dense output

    # ---- phase 1: single pass over x; z_local stash + per-batch z_global sums ----
    z_local, zg_sum = pl.pallas_call(
        functools.partial(_phase1_kernel, eps=eps, cdt=cdt, h2=h2, tn=TN,
                          nt_inner=nt_inner, n_valid=N, mask_tokens=mask_tokens,
                          gelu_approx=gelu_approx),
        out_shape=(jax.ShapeDtypeStruct((B, N_pad, h2), cdt),
                   jax.ShapeDtypeStruct((B, n_split, 1, h2), jnp.float32)),
        grid=(B, n_split, nt_inner),
        in_specs=[
            pl.BlockSpec((1, TN, in_dim), lambda b, s, t: (b, s * nt_inner + t, 0)),
            _full((1, in_dim)), _full((1, in_dim)),
            _full((in_dim, h_dim)), _full((1, h_dim)),
        ],
        out_specs=(
            pl.BlockSpec((1, TN, h2), lambda b, s, t: (b, s * nt_inner + t, 0)),
            pl.BlockSpec((1, 1, 1, h2), lambda b, s, t: (b, s, 0, 0)),
        ),
        compiler_params=pltpu.CompilerParams(
            dimension_semantics=("parallel", "parallel", "arbitrary"),
            vmem_limit_bytes=_VMEM_LIMIT),
    )(x_p, gamma, beta, w1c, b1)

    # ---- hoisted global term: g = mean(z_global) @ W2[h2:, :] + b2 (f32, per batch) ----
    zg_mean = jnp.sum(zg_sum, axis=(1, 2)) / N                  # (B, h2) f32
    g = (zg_mean @ w2g + b2.astype(jnp.float32)).reshape(B, 1, h2)

    # ---- phase 2: layer2 on stashed z_local, lane-dense (B, 1, N_pad) output ----
    out = pl.pallas_call(
        functools.partial(_phase2_kernel, cdt=cdt, gelu_approx=gelu_approx),
        out_shape=jax.ShapeDtypeStruct((B, 1, N_pad), x.dtype),
        grid=(B, NT),
        in_specs=[
            pl.BlockSpec((1, TN, h2), lambda b, t: (b, t, 0)),
            pl.BlockSpec((1, 1, h2), lambda b, t: (b, 0, 0)),
            _full((h2, h2)),
            _full((h2, h4)), _full((1, h4)),
            _full((1, h4)), _full((1, 1)),
        ],
        out_specs=pl.BlockSpec((1, 1, TN), lambda b, t: (b, 0, t)),
        compiler_params=pltpu.CompilerParams(
            dimension_semantics=("parallel", "parallel"),
            vmem_limit_bytes=_VMEM_LIMIT),
    )(z_local, g, w2l, w3c, b3, w4r, b4)

    if mask_tokens:
        out = out[:, :, :N]
    return out.reshape(B, N, 1)


def init_params(key, in_dim, h_dim, scale=0.5):
    h2, h4 = h_dim // 2, h_dim // 4
    ks = jax.random.split(key, 4)
    f32 = jnp.float32
    gamma = jnp.ones((1, in_dim), f32)          # LayerNorm default init
    beta = jnp.zeros((1, in_dim), f32)
    w1 = scale * jax.random.normal(ks[0], (in_dim, h_dim), f32)
    b1 = jnp.zeros((1, h_dim), f32)
    w2 = scale * jax.random.normal(ks[1], (h_dim, h2), f32)
    b2 = jnp.zeros((1, h2), f32)
    w3 = scale * jax.random.normal(ks[2], (h2, h4), f32)
    b3 = jnp.zeros((1, h4), f32)
    w4 = scale * jax.random.normal(ks[3], (h4, 1), f32)
    b4 = jnp.zeros((1, 1), f32)
    return (gamma, beta, w1, b1, w2, b2, w3, b3, w4, b4)


def mask_predictor_ref(x, params, *, h_dim, eps=1e-5, gelu_approx=False):
    """Pure-JAX f32 reference with the original (concat/broadcast) semantics."""
    gamma, beta, w1, b1, w2, b2, w3, b3, w4, b4 = params
    mu = jnp.mean(x, axis=-1, keepdims=True)
    var = jnp.mean((x - mu) ** 2, axis=-1, keepdims=True)
    xn = (x - mu) / jnp.sqrt(var + eps) * gamma[0] + beta[0]
    z = _gelu(xn @ w1 + b1[0], gelu_approx)
    h2 = h_dim // 2
    z_local, z_global = z[..., :h2], z[..., h2:]
    zg = jnp.mean(z_global, axis=1, keepdims=True)
    zg = jnp.broadcast_to(zg, z_local.shape)
    zcat = jnp.concatenate([z_local, zg], axis=-1)
    h = _gelu(zcat @ w2 + b2[0], gelu_approx)
    h = _gelu(h @ w3 + b3[0], gelu_approx)
    return h @ w4 + b4[0]


if __name__ == "__main__":
    B, N, IN_DIM, H_DIM = 2, 8, 32, 32

    key = jax.random.PRNGKey(0)
    kx, kp, kx2 = jax.random.split(key, 3)
    x = jax.random.normal(kx, (B, N, IN_DIM), jnp.float32)
    params = init_params(kp, IN_DIM, H_DIM)

    # f32 MXU + exact erf GELU: torch-parity path (exercises padding+masking, N=8 -> 128).
    ref_exact = mask_predictor_ref(x, params, h_dim=H_DIM, gelu_approx=False)
    out_f32 = jax.block_until_ready(
        mask_predictor(x, params, h_dim=H_DIM, matmul_dtype=jnp.float32,
                       gelu_approx=False))
    assert out_f32.shape == (B, N, 1)
    assert jnp.allclose(out_f32, ref_exact, atol=1e-4, rtol=1e-4)

    # Default fast path (bf16 operands + tanh GELU) vs tanh-GELU f32 reference.
    ref_tanh = mask_predictor_ref(x, params, h_dim=H_DIM, gelu_approx=True)
    out_fast = jax.block_until_ready(mask_predictor(x, params, h_dim=H_DIM))
    assert out_fast.shape == (B, N, 1)
    assert jnp.allclose(out_fast, ref_tanh, atol=1e-1, rtol=1e-1)

    # Multi-tile + split-reduction path (N multiple of 128, explicit token tile).
    N2 = 256
    x2 = jax.random.normal(kx2, (B, N2, IN_DIM), jnp.float32)
    ref2 = mask_predictor_ref(x2, params, h_dim=H_DIM, gelu_approx=True)
    out2 = jax.block_until_ready(
        mask_predictor(x2, params, h_dim=H_DIM, token_tile=128))
    assert out2.shape == (B, N2, 1)
    assert jnp.allclose(out2, ref2, atol=1e-1, rtol=1e-1)

    print("KERNEL_OK")
</pallas_src>

<mosaic_0001>
module attributes {stable_mosaic.version = 11 : i64} {
  func.func @_phase1_kernel(%arg0: i32, %arg1: i32, %arg2: i32, %arg3: memref<1x128x32xf32, #tpu.memory_space<vmem>>, %arg4: memref<1x32xf32, #tpu.memory_space<vmem>>, %arg5: memref<1x32xf32, #tpu.memory_space<vmem>>, %arg6: memref<32x32xf32, #tpu.memory_space<vmem>>, %arg7: memref<1x32xf32, #tpu.memory_space<vmem>>, %arg8: memref<1x128x16xf32, #tpu.memory_space<vmem>>, %arg9: memref<1x1x1x16xf32, #tpu.memory_space<vmem>>) attributes {dimension_semantics = [#tpu.dimension_semantics<parallel>, #tpu.dimension_semantics<parallel>, #tpu.dimension_semantics<arbitrary>], iteration_bounds = array<i64: 2, 1, 1>, scalar_prefetch = 0 : i64, scratch_operands = 0 : i64, tpu.core_type = #tpu.core_type<tc>, window_params = [{transform_indices = @transform_0, window_bounds = array<i64: 1, 128, 32>}, {pipeline_mode = #tpu.pipeline_mode<synchronous>, transform_indices = @transform_1, window_bounds = array<i64: 1, 32>}, {pipeline_mode = #tpu.pipeline_mode<synchronous>, transform_indices = @transform_2, window_bounds = array<i64: 1, 32>}, {pipeline_mode = #tpu.pipeline_mode<synchronous>, transform_indices = @transform_3, window_bounds = array<i64: 32, 32>}, {pipeline_mode = #tpu.pipeline_mode<synchronous>, transform_indices = @transform_4, window_bounds = array<i64: 1, 32>}, {transform_indices = @transform_5, window_bounds = array<i64: 1, 128, 16>}, {transform_indices = @transform_6, window_bounds = array<i64: 1, 1, 1, 16>}]} {
    %c0_i32 = arith.constant 0 : i32
    %0 = arith.cmpi eq, %arg2, %c0_i32 : i32
    %1 = arith.extui %0 : i1 to i32
    %c0_i32_0 = arith.constant 0 : i32
    %2 = arith.cmpi ne, %1, %c0_i32_0 : i32
    scf.if %2 {
      %cst_32 = arith.constant 0.000000e+00 : f32
      %65 = vector.broadcast %cst_32 : f32 to vector<1x1x1x16xf32>
      %c0_33 = arith.constant 0 : index
      %c0_34 = arith.constant 0 : index
      %c0_35 = arith.constant 0 : index
      %c0_36 = arith.constant 0 : index
      %66 = vector.load %arg9[%c0_33, %c0_34, %c0_35, %c0_36] : memref<1x1x1x16xf32, #tpu.memory_space<vmem>>, vector<1x1x1x16xf32>
      tpu.vector_store %arg9[%c0_33, %c0_34, %c0_35, %c0_36], %65 {strides = array<i32>} : memref<1x1x1x16xf32, #tpu.memory_space<vmem>>, vector<1x1x1x16xf32>,
    } else {
    }
    %c0 = arith.constant 0 : index
    %c0_1 = arith.constant 0 : index
    %c0_2 = arith.constant 0 : index
    %3 = vector.load %arg3[%c0, %c0_1, %c0_2] : memref<1x128x32xf32, #tpu.memory_space<vmem>>, vector<1x128x32xf32>
    %4 = vector.shape_cast %3 : vector<1x128x32xf32> to vector<128x32xf32>
    %c0_3 = arith.constant 0 : index
    %c0_4 = arith.constant 0 : index
    %5 = vector.load %arg4[%c0_3, %c0_4] : memref<1x32xf32, #tpu.memory_space<vmem>>, vector<1x32xf32>
    %c0_5 = arith.constant 0 : index
    %c0_6 = arith.constant 0 : index
    %6 = vector.load %arg5[%c0_5, %c0_6] : memref<1x32xf32, #tpu.memory_space<vmem>>, vector<1x32xf32>
    %cst = arith.constant dense<0.000000e+00> : vector<128xf32>
    %7 = vector.multi_reduction <add>, %4, %cst [1] : vector<128x32xf32> to vector<128xf32>
    %8 = vector.shape_cast %7 : vector<128xf32> to vector<128x1xf32>
    %cst_7 = arith.constant 3.200000e+01 : f32
    %9 = vector.broadcast %cst_7 : f32 to vector<128x1xf32>
    %10 = arith.divf %8, %9 : vector<128x1xf32>
    %11 = vector.broadcast %10 : vector<128x1xf32> to vector<128x32xf32>
    %12 = arith.subf %4, %11 : vector<128x32xf32>
    %13 = arith.mulf %12, %12 : vector<128x32xf32>
    %cst_8 = arith.constant dense<0.000000e+00> : vector<128xf32>
    %14 = vector.multi_reduction <add>, %13, %cst_8 [1] : vector<128x32xf32> to vector<128xf32>
    %15 = vector.shape_cast %14 : vector<128xf32> to vector<128x1xf32>
    %cst_9 = arith.constant 3.200000e+01 : f32
    %16 = vector.broadcast %cst_9 : f32 to vector<128x1xf32>
    %17 = arith.divf %15, %16 : vector<128x1xf32>
    %cst_10 = arith.constant 9.99999974E-6 : f32
    %18 = vector.broadcast %cst_10 : f32 to vector<128x1xf32>
    %19 = arith.addf %17, %18 : vector<128x1xf32>
    %20 = math.rsqrt %19 : vector<128x1xf32>
    %21 = vector.broadcast %20 : vector<128x1xf32> to vector<128x32xf32>
    %22 = arith.mulf %12, %21 : vector<128x32xf32>
    %23 = vector.broadcast %5 : vector<1x32xf32> to vector<128x32xf32>
    %24 = arith.mulf %22, %23 : vector<128x32xf32>
    %25 = vector.broadcast %6 : vector<1x32xf32> to vector<128x32xf32>
    %26 = arith.addf %24, %25 : vector<128x32xf32>
    %c0_11 = arith.constant 0 : index
    %c0_12 = arith.constant 0 : index
    %27 = vector.load %arg6[%c0_11, %c0_12] : memref<32x32xf32, #tpu.memory_space<vmem>>, vector<32x32xf32>
    %cst_13 = arith.constant dense<0.000000e+00> : vector<128x32xf32>
    %28 = tpu.matmul %26, %27, %cst_13 {dimension_numbers = #tpu.dot_dimension_numbers<[1], [0], [0], [1], [0, 0, 1, 1], [], []>} : vector<128x32xf32>, vector<32x32xf32>, vector<128x32xf32> -> vector<128x32xf32>
    %c0_14 = arith.constant 0 : index
    %c0_15 = arith.constant 0 : index
    %29 = vector.load %arg7[%c0_14, %c0_15] : memref<1x32xf32, #tpu.memory_space<vmem>>, vector<1x32xf32>
    %30 = vector.broadcast %29 : vector<1x32xf32> to vector<128x32xf32>
    %31 = arith.addf %28, %30 : vector<128x32xf32>
    %cst_16 = arith.constant 5.000000e-01 : f32
    %32 = vector.broadcast %cst_16 : f32 to vector<128x32xf32>
    %33 = arith.mulf %32, %31 : vector<128x32xf32>
    %cst_17 = arith.constant 0.707106769 : f32
    %34 = vector.broadcast %cst_17 : f32 to vector<128x32xf32>
    %35 = arith.mulf %31, %34 : vector<128x32xf32>
    %36 = math.erf %35 : vector<128x32xf32>
    %cst_18 = arith.constant 1.000000e+00 : f32
    %37 = vector.broadcast %cst_18 : f32 to vector<128x32xf32>
    %38 = arith.addf %37, %36 : vector<128x32xf32>
    %39 = arith.mulf %33, %38 : vector<128x32xf32>
    %40 = vector.extract_strided_slice %39 {offsets = [0, 0], sizes = [128, 16], strides = [1, 1]} : vector<128x32xf32> to vector<128x16xf32>
    %c0_19 = arith.constant 0 : index
    %c0_20 = arith.constant 0 : index
    %c0_21 = arith.constant 0 : index
    %41 = vector.load %arg8[%c0_19, %c0_20, %c0_21] : memref<1x128x16xf32, #tpu.memory_space<vmem>>, vector<1x128x16xf32>
    %42 = vector.shape_cast %41 : vector<1x128x16xf32> to vector<128x16xf32>
    %43 = vector.shape_cast %40 : vector<128x16xf32> to vector<1x128x16xf32>
    tpu.vector_store %arg8[%c0_19, %c0_20, %c0_21], %43 {strides = array<i32>} : memref<1x128x16xf32, #tpu.memory_space<vmem>>, vector<1x128x16xf32>,
    %44 = vector.extract_strided_slice %39 {offsets = [0, 16], sizes = [128, 16], strides = [1, 1]} : vector<128x32xf32> to vector<128x16xf32>
    %c1_i32 = arith.constant 1 : i32
    %45 = arith.muli %arg1, %c1_i32 : i32
    %46 = arith.addi %45, %arg2 : i32
    %47 = tpu.iota {dimensions = array<i32: 0>} : vector<128x1xi32>
    %c128_i32 = arith.constant 128 : i32
    %48 = arith.muli %46, %c128_i32 : i32
    %49 = vector.broadcast %48 : i32 to vector<128x1xi32>
    %50 = arith.addi %47, %49 : vector<128x1xi32>
    %c8_i32 = arith.constant 8 : i32
    %51 = vector.broadcast %c8_i32 : i32 to vector<128x1xi32>
    %52 = arith.cmpi slt, %50, %51 : vector<128x1xi32>
    %cst_22 = arith.constant 0.000000e+00 : f32
    %53 = vector.shape_cast %52 : vector<128x1xi1> to vector<128x1xi1>
    %54 = vector.broadcast %53 : vector<128x1xi1> to vector<128x16xi1>
    %55 = vector.broadcast %cst_22 : f32 to vector<128x16xf32>
    %56 = arith.select %54, %44, %55 : vector<128x16xi1>, vector<128x16xf32>
    %c0_23 = arith.constant 0 : index
    %c0_24 = arith.constant 0 : index
    %c0_25 = arith.constant 0 : index
    %c0_26 = arith.constant 0 : index
    %57 = vector.load %arg9[%c0_23, %c0_24, %c0_25, %c0_26] : memref<1x1x1x16xf32, #tpu.memory_space<vmem>>, vector<1x1x1x16xf32>
    %58 = vector.shape_cast %57 : vector<1x1x1x16xf32> to vector<1x16xf32>
    %cst_27 = arith.constant dense<0.000000e+00> : vector<16xf32>
    %59 = vector.multi_reduction <add>, %56, %cst_27 [0] : vector<128x16xf32> to vector<16xf32>
    %60 = vector.shape_cast %59 : vector<16xf32> to vector<1x16xf32>
    %61 = arith.addf %58, %60 : vector<1x16xf32>
    %c0_28 = arith.constant 0 : index
    %c0_29 = arith.constant 0 : index
    %c0_30 = arith.constant 0 : index
    %c0_31 = arith.constant 0 : index
    %62 = vector.load %arg9[%c0_28, %c0_29, %c0_30, %c0_31] : memref<1x1x1x16xf32, #tpu.memory_space<vmem>>, vector<1x1x1x16xf32>
    %63 = vector.shape_cast %62 : vector<1x1x1x16xf32> to vector<1x16xf32>
    %64 = vector.shape_cast %61 : vector<1x16xf32> to vector<1x1x1x16xf32>
    tpu.vector_store %arg9[%c0_28, %c0_29, %c0_30, %c0_31], %64 {strides = array<i32>} : memref<1x1x1x16xf32, #tpu.memory_space<vmem>>, vector<1x1x1x16xf32>,
    return
  }
  func.func @transform_0(%arg0: i32, %arg1: i32, %arg2: i32) -> (i32, i32, i32) {
    %c1_i32 = arith.constant 1 : i32
    %0 = arith.muli %arg1, %c1_i32 : i32
    %1 = arith.addi %0, %arg2 : i32
    %c0_i32 = arith.constant 0 : i32
    %c0_i32_0 = arith.constant 0 : i32
    return %arg0, %1, %c0_i32 : i32, i32, i32
  }
  func.func @transform_1(%arg0: i32, %arg1: i32, %arg2: i32) -> (i32, i32) {
    %c0_i32 = arith.constant 0 : i32
    %c0_i32_0 = arith.constant 0 : i32
    %c0_i32_1 = arith.constant 0 : i32
    return %c0_i32, %c0_i32_0 : i32, i32
  }
  func.func @transform_2(%arg0: i32, %arg1: i32, %arg2: i32) -> (i32, i32) {
    %c0_i32 = arith.constant 0 : i32
    %c0_i32_0 = arith.constant 0 : i32
    %c0_i32_1 = arith.constant 0 : i32
    return %c0_i32, %c0_i32_0 : i32, i32
  }
  func.func @transform_3(%arg0: i32, %arg1: i32, %arg2: i32) -> (i32, i32) {
    %c0_i32 = arith.constant 0 : i32
    %c0_i32_0 = arith.constant 0 : i32
    %c0_i32_1 = arith.constant 0 : i32
    return %c0_i32, %c0_i32_0 : i32, i32
  }
  func.func @transform_4(%arg0: i32, %arg1: i32, %arg2: i32) -> (i32, i32) {
    %c0_i32 = arith.constant 0 : i32
    %c0_i32_0 = arith.constant 0 : i32
    %c0_i32_1 = arith.constant 0 : i32
    return %c0_i32, %c0_i32_0 : i32, i32
  }
  func.func @transform_5(%arg0: i32, %arg1: i32, %arg2: i32) -> (i32, i32, i32) {
    %c1_i32 = arith.constant 1 : i32
    %0 = arith.muli %arg1, %c1_i32 : i32
    %1 = arith.addi %0, %arg2 : i32
    %c0_i32 = arith.constant 0 : i32
    %c0_i32_0 = arith.constant 0 : i32
    return %arg0, %1, %c0_i32 : i32, i32, i32
  }
  func.func @transform_6(%arg0: i32, %arg1: i32, %arg2: i32) -> (i32, i32, i32, i32) {
    %c0_i32 = arith.constant 0 : i32
    %c0_i32_0 = arith.constant 0 : i32
    %c0_i32_1 = arith.constant 0 : i32
    return %arg0, %arg1, %c0_i32, %c0_i32_0 : i32, i32, i32, i32
  }
}

</mosaic_0001>

<bundles_post_ra>
// kernel: tpu_custom_call.1
= control target key start
LH: loop header
LB: loop body
LE: loop exit
PB: predicated region body
PF: predicated region fallthrough
CT: control target
= control target key end

     0   :  { %12 = vsyncpa [#allocation3], 0  ;;  %s3418_s0 = inlined_call_operand.vmem [shape: f32[2,128,32], index: 0, kind: input, shape index: {}]   ;;  %s3419_s1 = inlined_call_operand.vmem [shape: f32[1,32], index: 1, kind: input, shape index: {}]   ;;  %s3420_s2 = inlined_call_operand.vmem [shape: f32[1,32], index: 2, kind: input, shape index: {}]   ;;  %s3421_s3 = inlined_call_operand.vmem [shape: f32[32,32], index: 3, kind: input, shape index: {}]   ;;  %s3422_s4 = inlined_call_operand.vmem [shape: f32[1,32], index: 4, kind: input, shape index: {}]   ;;  %s3423_s5 = inlined_call_operand.vmem [shape: f32[2,128,16], index: 5, kind: output, shape index: {0}]   ;;  %s3424_s6 = inlined_call_operand.hbm [shape: f32[2,1,1,16], index: 6, kind: output, shape index: {1}]  }
   0x1   :  { %14 = vsyncpa [#allocation3 + $0x1], 0  ;;  %s2175_s21 = smov 0   ;;  %s2177_s22 = smov 0  }
   0x2   :  { %s2179_s23 = smov 0   ;;  %s2181_s24 = smov 0  }
   0x3   :  { %s2183_s25 = smov 0   ;;  %s2185_s26 = smov 0  }
   0x4 LB: > { %s1872_s27 = sadd.s32 4294967295, %s2135_s26   ;;  %s1873_s28 = sadd.s32 4294967294, %s2135_s26   ;;  %s2135_s26 = sphi %s2185_s26, %s20_s26   ;;  %s2131_s25 = sphi %s2183_s25, %s3471_s25   ;;  %s2127_s24 = sphi %s2181_s24, %s3470_s24   ;;  %s2123_s23 = sphi %s2179_s23, %s3469_s23   ;;  %s2119_s22 = sphi %s2177_s22, %s3468_s22   ;;  %s2115_s21 = sphi %s2175_s21, %s3467_s21  }
   0x5   : > { %s39_s29 = sadd.s32 1, %s2131_s25  ;;  %s192_s30 = sadd.s32 1, %s2123_s23 }
   0x6   : > { %p41_p0 = scmp.ge.s32.totalorder %s39_s29, 2  ;;  %p202_p1 = scmp.ne.s32.totalorder %s2123_s23, %s2119_s22 }
   0x7   : > { %p203_p2 = scmp.eq.s32.totalorder %s1872_s27, 1  ;;  %p208_p3 = scmp.ne.s32.totalorder %s2119_s22, %s2115_s21 }
   0x8   : > { %s3473_s29 = smov (%p41_p0, %s39_s29), 0  ;;  %p209_p5 = scmp.eq.s32.totalorder %s1873_s28, 1 }
   0x9   : > { %p2215_p4 = por %p203_p2, %p202_p1  ;;  %s187_s8 = ssub.s32 %s2131_s25, %s3473_s29 }
   0xa   : > { %p1876_p6 = scmp.ge.s32.totalorder %s2135_s26, 1  ;;  %p190_p7 = scmp.eq.s32.totalorder %s187_s8, 0 }
   0xb   : > { %p2222_p8 = por %p209_p5, %p208_p3  ;;  %p254_p9 = scmp.lt.s32.totalorder %s2135_s26, 3 }
   0xc   : > { %s2228_s10 = scalar_select %p190_p7, %s2123_s23, %s192_s30  }
   0xd   : > { %p255_p10 = pnand %p1876_p6, %p254_p9 }
   0xe   : > { %p300_p11 = scmp.lt.s32.totalorder (!%p255_p10), %s2127_s24, 1  ;;  %s2138_s27 = smov (!%p255_p10), 112  }
   0xf   : > { %258 = sbr.rel (%p255_p10) target bundleno = 673 (0x2a1), region = 40  ;;  %s296_s28 = sand.u32 (!%p255_p10), 1, %s2119_s22  }
  0x10   : > { %s3360_s30 = scalar_lea.vmem (!%p255_p10), [#allocation2], %s296_s28  ;;  %s1757_s14 = scalar_lea.hbm (!%p255_p10), %s3424_s6, %s2127_s24 }
  0x11   : > { %s1761_s16 = sshll.u32 (!%p255_p10), %s1757_s14, 4  ;;  %s1743_s17 = scalar_lea.sflag (!%p255_p10), [#allocation3], %s296_s28  ;;  %s1762_s16 = int_to_ptr.hbm [resolvable:$true] %s1761_s16 }
  0x12   : > { %s2071_s18 = sshra.s32 (!%p255_p10), %s1762_s16, 4  ;;  %s2072_s18 = int_to_ptr.hbm [resolvable:$true] %s2071_s18 }
  0x13   : > { %s2073_s19 = scalar_lea.hbm (!%p255_p10), %s2072_s18, 1  ;;  %p2078_p1 = scmp.lt.s32.totalorder (!%p255_p10), %s2072_s18, %s3424_s6 }
  0x14   : > { %s2232_s11 = scalar_select %p300_p11, %s2127_s24, 1  ;;  %vm346_vm0 = vcmask 261120   ;;  %v2137_v30 = vmov 32.0  }
  0x15   : > { %1990 = vrcp.f32 %v2137_v30  ;;  %p2074_p12 = scmp.ne.s32.totalorder %s2072_s18, %s2073_s19 }
  0x16   : > { %s1915_s12 = sshll.u32 %s2232_s11, 7  ;;  %s2077_s11 = scalar_lea.hbm %s3424_s6, 2 }
  0x17   : > { %s2240_s15 = scalar_lea.vmem %s3418_s0, %s1915_s12  ;;  %s2896_s20 = scalar_lea.vmem %s3423_s5, %s1915_s12 }
  0x18   : > { %v2243_v0 = vld [vmem:[%s2240_s15 + $0x60] sm:$0xff]  ;;  %v2247_v2 = vld [vmem:[%s2240_s15 + $0x48] sm:$0xff]  ;;  %v2270_v14 = vld [vmem:[%s2240_s15 + $0x50] sm:$0xff]  ;;  %p2075_p13 = pnand %p2074_p12, %p2215_p4  ;;  %p2079_p2 = scmp.lt.s32.totalorder %s2077_s11, %s2073_s19 }
  0x19   : > { %v328_v1 = vld [vmem:[%s2240_s15] sm:$0xff]  ;;  %v383_v3 = vsel %vm346_vm0, %v2243_v0, 0.0  ;;  %v374_v5 = vsel %vm346_vm0, %v2247_v2, 0.0  ;;  %v2257_v8 = vld [vmem:[%s2240_s15 + $0x68] sm:$0xff]  ;;  %v377_v17 = vsel %vm346_vm0, %v2270_v14, 0.0  ;;  %v2279_v18 = vld [vmem:[%s2240_s15 + $0x10] sm:$0xff] }
  0x1a   : > { %v347_v4 = vsel %vm346_vm0, %v328_v1, 0.0  ;;  %384 = vadd.xlane.f32.xlu1 %v383_v3  ;;  %375 = vadd.xlane.f32.xlu2 %v374_v5  ;;  %v332_v6 = vld [vmem:[%s2240_s15 + $0x20] sm:$0xff]  ;;  %v386_v11 = vsel %vm346_vm0, %v2257_v8, 0.0  ;;  %v2264_v12 = vld [vmem:[%s2240_s15 + $0x28] sm:$0xff]  ;;  %v2282_v19 = vld [vmem:[%s2240_s15 + $0x70] sm:$0xff]  ;;  %v353_v21 = vsel %vm346_vm0, %v2279_v18, 0.0  ;;  %p2076_p0 = pneg %p2075_p13  ;;  %p2080_p3 = por %p2079_p2, %p2078_p1 }
  0x1b   : > { %348 = vadd.xlane.f32.xlu0 %v347_v4  ;;  %v336_v7 = vld [vmem:[%s2240_s15 + $0x40] sm:$0xff]  ;;  %v359_v9 = vsel %vm346_vm0, %v332_v6, 0.0  ;;  %v2267_v13 = vld [vmem:[%s2240_s15 + $0x8] sm:$0xff]  ;;  %v362_v15 = vsel %vm346_vm0, %v2264_v12, 0.0  ;;  %v2285_v20 = vld [vmem:[%s2240_s15 + $0x30] sm:$0xff]  ;;  %v389_v22 = vsel %vm346_vm0, %v2282_v19, 0.0  ;;  %v1991_v31 = vpop.eup %1990 }
  0x1c   : > { %v371_v10 = vsel %vm346_vm0, %v336_v7, 0.0  ;;  %v350_v16 = vsel %vm346_vm0, %v2267_v13, 0.0  ;;  %v365_v23 = vsel %vm346_vm0, %v2285_v20, 0.0  ;;  %v2294_v24 = vld [vmem:[%s2240_s15 + $0x58] sm:$0xff]  ;;  %v396_v32 = vmul.f32 32.0, %v1991_v31  ;;  %p2081_p5 = pnand %p2080_p3, %p2076_p0 }
  0x1d   : > { %v2297_v25 = vld [vmem:[%s2240_s15 + $0x78] sm:$0xff]  ;;  %v380_v26 = vsel %vm346_vm0, %v2294_v24, 0.0  ;;  %vm400_vm1 = vweird.f32 %v1991_v31 }
  0x1e   : > { %v392_v27 = vsel %vm346_vm0, %v2297_v25, 0.0  ;;  %v2304_v28 = vld [vmem:[%s2240_s15 + $0x38] sm:$0xff]  ;;  %v397_v33 = vsub.f32 1.0, %v396_v32 }
  0x1f   : > { %v368_v29 = vsel %vm346_vm0, %v2304_v28, 0.0  ;;  %v2321_v51 = vld [vmem:[%s2240_s15 + $0x18] sm:$0xff]  ;;  %s1759_s15 = sshll.u32 %s3360_s30, 4  ;;  %s1760_s15 = int_to_ptr.vmem [resolvable:$true] %s1759_s15 }
  0x20   : > { %v398_v34 = vmul.f32 %v1991_v31, %v397_v33  ;;  %v356_v56 = vsel %vm346_vm0, %v2321_v51, 0.0 }
  0x22   : > { %360 = vadd.xlane.f32.xlu1 %v359_v9  ;;  %387 = vadd.xlane.f32.xlu2 %v386_v11  ;;  %v399_v35 = vadd.f32 %v1991_v31, %v398_v34 }
  0x23   : > { %372 = vadd.xlane.f32.xlu0 %v371_v10 }
  0x24   : > { %v2308_v36 = vsel %vm400_vm1, %v1991_v31, %v399_v35 }
  0x2a   : > { %363 = vadd.xlane.f32.xlu1 %v362_v15  ;;  %378 = vadd.xlane.f32.xlu2 %v377_v17 }
  0x2b   : > { %351 = vadd.xlane.f32.xlu0 %v350_v16 }
  0x32   : > { %354 = vadd.xlane.f32.xlu1 %v353_v21  ;;  %366 = vadd.xlane.f32.xlu2 %v365_v23 }
  0x33   : > { %390 = vadd.xlane.f32.xlu0 %v389_v22 }
  0x3a   : > { %381 = vadd.xlane.f32.xlu1 %v380_v26  ;;  %393 = vadd.xlane.f32.xlu2 %v392_v27 }
  0x42   : > { %369 = vadd.xlane.f32.xlu1 %v368_v29 }
  0x8d   : > { %v385_v37 = vpop.xlane.xlu1 %384  ;;  %v376_v40 = vpop.xlane.xlu2 %375 }
  0x8e   : > { %v349_v38 = vpop.xlane.xlu0 %348  ;;  %v414_v46 = vmul.f32 %v2308_v36, %v385_v37  ;;  %v411_v50 = vmul.f32 %v2308_v36, %v376_v40 }
  0x8f   : > { %v402_v39 = vmul.f32 %v2308_v36, %v349_v38 }
  0x90   : > { %v2328_v54 = vsub.f32 %v2243_v0, %v414_v46  ;;  %v2337_v58 = vsub.f32 %v2247_v2, %v411_v50 }
  0x91   : > { %v2311_v41 = vsub.f32 %v328_v1, %v402_v39 }
  0x92   : > { %v446_v3 = vmul.f32 %v2328_v54, %v2328_v54  ;;  %v443_v4 = vmul.f32 %v2337_v58, %v2337_v58 }
  0x93   : > { %v434_v42 = vmul.f32 %v2311_v41, %v2311_v41 }
  0x94   : > { %v477_v11 = vsel %vm346_vm0, %v443_v4, 0.0 }
  0x95   : > { %v450_v43 = vsel %vm346_vm0, %v434_v42, 0.0  ;;  %v361_v44 = vpop.xlane.xlu1 %360  ;;  %v388_v49 = vpop.xlane.xlu2 %387 }
  0x96   : > { %451 = vadd.xlane.f32.xlu0 %v450_v43  ;;  %v373_v45 = vpop.xlane.xlu0 %372  ;;  %v406_v47 = vmul.f32 %v2308_v36, %v361_v44  ;;  %v415_v63 = vmul.f32 %v2308_v36, %v388_v49 }
  0x97   : > { %v410_v48 = vmul.f32 %v2308_v36, %v373_v45 }
  0x98   : > { %v2323_v52 = vsub.f32 %v332_v6, %v406_v47  ;;  %v2352_v6 = vsub.f32 %v2257_v8, %v415_v63 }
  0x99   : > { %v2325_v53 = vsub.f32 %v336_v7, %v410_v48  ;;  %v486_v7 = vsel %vm346_vm0, %v446_v3, 0.0 }
  0x9a   : > { %v438_v55 = vmul.f32 %v2323_v52, %v2323_v52  ;;  %v447_v22 = vmul.f32 %v2352_v6, %v2352_v6 }
  0x9b   : > { %v442_v57 = vmul.f32 %v2325_v53, %v2325_v53 }
  0x9c   : > { %v462_v59 = vsel %vm346_vm0, %v438_v55, 0.0  ;;  %v489_v29 = vsel %vm346_vm0, %v447_v22, 0.0 }
  0x9d   : > { %v474_v60 = vsel %vm346_vm0, %v442_v57, 0.0  ;;  %v364_v61 = vpop.xlane.xlu1 %363  ;;  %463 = vadd.xlane.f32.xlu1 %v462_v59  ;;  %v379_v1 = vpop.xlane.xlu2 %378  ;;  %v747_v57 = vld [vmem:[%s3421_s3 + $0x18] sm:$0xff]  ;;  %v745_v59 = vld [vmem:[%s3421_s3 + $0x8] sm:$0xff] }
  0x9e   : > { %357 = vadd.xlane.f32.xlu0 %v356_v56  ;;  %v352_v62 = vpop.xlane.xlu0 %351  ;;  %475 = vadd.xlane.f32.xlu2 %v474_v60  ;;  %v407_v2 = vmul.f32 %v2308_v36, %v364_v61  ;;  %v412_v17 = vmul.f32 %v2308_v36, %v379_v1  ;;  %v744_v60 = vld [vmem:[%s3421_s3] sm:$0xff] }
  0x9f   : > { %v403_v0 = vmul.f32 %v2308_v36, %v352_v62  ;;  %812 = vmatpush.msra.mxu0 %v747_v57  ;;  %1917 = vmatpush.msra.mxu1 %v747_v57 }
  0xa0   : > { %v2358_v10 = vsub.f32 %v2264_v12, %v407_v2  ;;  %v2373_v27 = vsub.f32 %v2270_v14, %v412_v17  ;;  %1918 = vmatpush.msra.mxu2 %v747_v57  ;;  %1919 = vmatpush.msra.mxu3 %v747_v57 }
  0xa1   : > { %v2349_v5 = vsub.f32 %v2267_v13, %v403_v0 }
  0xa2   : > { %v439_v23 = vmul.f32 %v2358_v10, %v2358_v10  ;;  %v444_v37 = vmul.f32 %v2373_v27, %v2373_v27 }
  0xa3   : > { %v435_v9 = vmul.f32 %v2349_v5, %v2349_v5 }
  0xa4   : > { %v465_v32 = vsel %vm346_vm0, %v439_v23, 0.0  ;;  %v480_v42 = vsel %vm346_vm0, %v444_v37, 0.0 }
  0xa5   : > { %v453_v15 = vsel %vm346_vm0, %v435_v9, 0.0  ;;  %v355_v16 = vpop.xlane.xlu1 %354  ;;  %v367_v21 = vpop.xlane.xlu2 %366 }
  0xa6   : > { %487 = vadd.xlane.f32.xlu0 %v486_v7  ;;  %454 = vadd.xlane.f32.xlu1 %v453_v15  ;;  %v391_v13 = vpop.xlane.xlu0 %390  ;;  %v404_v12 = vmul.f32 %v2308_v36, %v355_v16 }
  0xa7   : > { %478 = vadd.xlane.f32.xlu2 %v477_v11  ;;  %v416_v8 = vmul.f32 %v2308_v36, %v391_v13 }
  0xa8   : > { %v2379_v31 = vsub.f32 %v2279_v18, %v404_v12 }
  0xa9   : > { %v2370_v26 = vsub.f32 %v2282_v19, %v416_v8  ;;  %v408_v19 = vmul.f32 %v2308_v36, %v367_v21 }
  0xaa   : > { %v436_v18 = vmul.f32 %v2379_v31, %v2379_v31 }
  0xab   : > { %v448_v30 = vmul.f32 %v2370_v26, %v2370_v26  ;;  %v2394_v40 = vsub.f32 %v2285_v20, %v408_v19 }
  0xac   : > { %v456_v45 = vsel %vm346_vm0, %v436_v18, 0.0 }
  0xad   : > { %v492_v33 = vsel %vm346_vm0, %v448_v30, 0.0  ;;  %v382_v34 = vpop.xlane.xlu1 %381  ;;  %v394_v35 = vpop.xlane.xlu2 %393  ;;  %v440_v20 = vmul.f32 %v2394_v40, %v2394_v40 }
  0xae   : > { %490 = vadd.xlane.f32.xlu0 %v489_v29  ;;  %493 = vadd.xlane.f32.xlu1 %v492_v33  ;;  %v413_v14 = vmul.f32 %v2308_v36, %v382_v34  ;;  %v417_v38 = vmul.f32 %v2308_v36, %v394_v35 }
  0xaf   : > { %466 = vadd.xlane.f32.xlu2 %v465_v32 }
  0xb0   : > { %v2391_v39 = vsub.f32 %v2294_v24, %v413_v14  ;;  %v2400_v44 = vsub.f32 %v2297_v25, %v417_v38  ;;  %v468_v25 = vsel %vm346_vm0, %v440_v20, 0.0  ;;  %v2476_v20 = vld [vmem:[%s3420_s2] ss:$0 sm:$0xff] }
  0xb2   : > { %v445_v43 = vmul.f32 %v2391_v39, %v2391_v39  ;;  %v449_v48 = vmul.f32 %v2400_v44, %v2400_v44 }
  0xb4   : > { %v483_v46 = vsel %vm346_vm0, %v445_v43, 0.0  ;;  %v495_v55 = vsel %vm346_vm0, %v449_v48, 0.0  ;;  %v2466_v43 = vld [vmem:[%s3419_s1] ss:$0 sm:$0xff] }
  0xb5   : > { %v370_v47 = vpop.xlane.xlu1 %369 }
  0xb6   : > { %481 = vadd.xlane.f32.xlu0 %v480_v42  ;;  %484 = vadd.xlane.f32.xlu1 %v483_v46  ;;  %v409_v24 = vmul.f32 %v2308_v36, %v370_v47 }
  0xb7   : > { %457 = vadd.xlane.f32.xlu2 %v456_v45 }
  0xb8   : > { %v2410_v49 = vsub.f32 %v2304_v28, %v409_v24  ;;  %v746_v28 = vld [vmem:[%s3421_s3 + $0x10] sm:$0xff] }
  0xb9   : > { %813 = vmatpush.msra.mxu0 %v746_v28  ;;  %1920 = vmatpush.msra.mxu1 %v746_v28 }
  0xba   : > { %v441_v50 = vmul.f32 %v2410_v49, %v2410_v49  ;;  %1921 = vmatpush.msra.mxu2 %v746_v28  ;;  %1922 = vmatpush.msra.mxu3 %v746_v28 }
  0xbb   : > { %814 = vmatpush.msra.mxu0 %v745_v59  ;;  %1923 = vmatpush.msra.mxu1 %v745_v59 }
  0xbc   : > { %v471_v56 = vsel %vm346_vm0, %v441_v50, 0.0  ;;  %1924 = vmatpush.msra.mxu2 %v745_v59  ;;  %1925 = vmatpush.msra.mxu3 %v745_v59 }
  0xbd   : > { %815 = vmatpush.msra.mxu0 %v744_v60  ;;  %1926 = vmatpush.msra.mxu1 %v744_v60 }
  0xbe   : > { %469 = vadd.xlane.f32.xlu0 %v468_v25  ;;  %472 = vadd.xlane.f32.xlu1 %v471_v56 }
  0xbf   : > { %496 = vadd.xlane.f32.xlu2 %v495_v55  ;;  %1927 = vmatpush.msra.mxu2 %v744_v60 }
  0xc0   : > { %1928 = vmatpush.msra.mxu3 %v744_v60 }
 0x109   : > { %v452_v61 = vpop.xlane.xlu0 %451 }
 0x10a   : > { %v498_v62 = vmul.f32 %v452_v61, %v2308_v36 }
 0x10c   : > { %v514_v63 = vadd.f32 1e-05, %v498_v62 }
 0x10e   : > { %1992 = vrsqrt.f32 %v514_v63  ;;  %vm536_vm3 = vweird.f32 %v514_v63 }
 0x110   : > { %v464_v0 = vpop.xlane.xlu1 %463 }
 0x111   : > { %v358_v1 = vpop.xlane.xlu0 %357  ;;  %v502_v3 = vmul.f32 %v464_v0, %v2308_v36  ;;  %v476_v2 = vpop.xlane.xlu2 %475 }
 0x112   : > { %v405_v4 = vmul.f32 %v2308_v36, %v358_v1  ;;  %v506_v7 = vmul.f32 %v476_v2, %v2308_v36 }
 0x113   : > { %v2433_v11 = vadd.f32 1e-05, %v502_v3 }
 0x114   : > { %v1993_v9 = vpop.eup %1992  ;;  %v2436_v15 = vsub.f32 %v2321_v51, %v405_v4  ;;  %v2438_v13 = vadd.f32 1e-05, %v506_v7 }
 0x115   : > { %v531_v16 = vmul.f32 %v1993_v9, %v514_v63  ;;  %1994 = vrsqrt.f32 %v2433_v11  ;;  %vm537_vm2 = vweird.f32 %v1993_v9  ;;  %vm576_vm5 = vweird.f32 %v2433_v11 }
 0x116   : > { %v437_v17 = vmul.f32 %v2436_v15, %v2436_v15  ;;  %1996 = vrsqrt.f32 %v2438_v13  ;;  %vm538_vm4 = vmor %vm536_vm3, %vm537_vm2  ;;  %vm616_vm7 = vweird.f32 %v2438_v13 }
 0x117   : > { %v532_v8 = vmul.f32 %v1993_v9, %v531_v16 }
 0x118   : > { %v459_v21 = vsel %vm346_vm0, %v437_v17, 0.0 }
 0x119   : > { %v533_v22 = vmul.f32 0.5, %v532_v8  ;;  %v455_v12 = vpop.xlane.xlu1 %454  ;;  %460 = vadd.xlane.f32.xlu0 %v459_v21  ;;  %v488_v23 = vpop.xlane.xlu0 %487 }
 0x11a   : > { %v479_v29 = vpop.xlane.xlu2 %478  ;;  %v499_v51 = vmul.f32 %v455_v12, %v2308_v36  ;;  %v510_v30 = vmul.f32 %v488_v23, %v2308_v36 }
 0x11b   : > { %v534_v32 = vsub.f32 1.5, %v533_v22  ;;  %v507_v33 = vmul.f32 %v479_v29, %v2308_v36  ;;  %v2448_v34 = vpop.eup %1994 }
 0x11c   : > { %v2450_v19 = vadd.f32 1e-05, %v499_v51  ;;  %v2452_v14 = vadd.f32 1e-05, %v510_v30  ;;  %v2454_v35 = vpop.eup %1996  ;;  %v571_v38 = vmul.f32 %v2448_v34, %v2433_v11  ;;  %vm577_vm6 = vweird.f32 %v2448_v34 }
 0x11d   : > { %v535_v37 = vmul.f32 %v1993_v9, %v534_v32  ;;  %v2458_v18 = vadd.f32 1e-05, %v507_v33  ;;  %v611_v42 = vmul.f32 %v2454_v35, %v2438_v13  ;;  %vm617_vm8 = vweird.f32 %v2454_v35  ;;  %vm2511_vm9 = vmor %vm576_vm5, %vm577_vm6 }
 0x11e   : > { %1998 = vrsqrt.f32 %v2450_v19  ;;  %v572_v46 = vmul.f32 %v2448_v34, %v571_v38  ;;  %vm2518_vm10 = vmor %vm616_vm7, %vm617_vm8  ;;  %vm546_vm11 = vweird.f32 %v2450_v19  ;;  %vm656_vm14 = vweird.f32 %v2452_v14 }
 0x11f   : > { %v539_v45 = vsel %vm538_vm4, %v1993_v9, %v535_v37  ;;  %2000 = vrsqrt.f32 %v2458_v18  ;;  %v612_v47 = vmul.f32 %v2454_v35, %v611_v42  ;;  %vm626_vm12 = vweird.f32 %v2458_v18 }
 0x120   : > { %2002 = vrsqrt.f32 %v2452_v14  ;;  %v690_v24 = vmul.f32 %v539_v45, %v2311_v41  ;;  %v573_v48 = vmul.f32 0.5, %v572_v46 }
 0x121   : > { %v494_v25 = vpop.xlane.xlu1 %493  ;;  %v491_v50 = vpop.xlane.xlu0 %490  ;;  %v613_v55 = vmul.f32 0.5, %v612_v47 }
 0x122   : > { %v467_v56 = vpop.xlane.xlu2 %466  ;;  %v512_v57 = vmul.f32 %v494_v25, %v2308_v36  ;;  %v511_v28 = vmul.f32 %v491_v50, %v2308_v36  ;;  %v709_v59 = vmul.f32 %v2466_v43, %v690_v24  ;;  %v574_v61 = vsub.f32 1.5, %v573_v48 }
 0x123   : > { %v503_v41 = vmul.f32 %v467_v56, %v2308_v36  ;;  %v614_v62 = vsub.f32 1.5, %v613_v55 }
 0x124   : > { %v2483_v60 = vpop.eup %1998  ;;  %v2485_v63 = vadd.f32 1e-05, %v512_v57  ;;  %v728_v0 = vadd.f32 %v2476_v20, %v709_v59  ;;  %v2495_v4 = vadd.f32 1e-05, %v511_v28  ;;  %v575_v8 = vmul.f32 %v2448_v34, %v574_v61 }
 0x125   : > { %v2488_v1 = vpop.eup %2000  ;;  %v541_v3 = vmul.f32 %v2483_v60, %v2450_v19  ;;  %v2493_v2 = vadd.f32 1e-05, %v503_v41  ;;  %v615_v21 = vmul.f32 %v2454_v35, %v614_v62  ;;  %vm547_vm13 = vweird.f32 %v2483_v60 }
 0x126   : > { %v2497_v7 = vpop.eup %2002  ;;  %v621_v9 = vmul.f32 %v2488_v1, %v2458_v18  ;;  %2004 = vrsqrt.f32 %v2485_v63  ;;  %1881 = vmatmul.msk.f32.vlgmr.msra.gmra.mxu0 %vm346_vm0, %v728_v0  ;;  %v579_v47 = vsel %vm2511_vm9, %v2448_v34, %v575_v8  ;;  %vm627_vm15 = vweird.f32 %v2488_v1  ;;  %vm2551_vm1 = vmor %vm546_vm11, %vm547_vm13 }
 0x127   : > { %v542_v16 = vmul.f32 %v2483_v60, %v541_v3  ;;  %v651_v17 = vmul.f32 %v2497_v7, %v2452_v14  ;;  %2006 = vrsqrt.f32 %v2493_v2  ;;  %v619_v24 = vsel %vm2518_vm10, %v2454_v35, %v615_v21  ;;  %vm2587_vm7 = vmor %vm626_vm12, %vm627_vm15 }
 0x128   : > { %v622_v22 = vmul.f32 %v2488_v1, %v621_v9  ;;  %2008 = vrsqrt.f32 %v2495_v4  ;;  %vm657_vm2 = vweird.f32 %v2497_v7  ;;  %v694_v19 = vmul.f32 %v579_v47, %v2323_v52 }
 0x129   : > { %v543_v23 = vmul.f32 0.5, %v542_v16  ;;  %v652_v29 = vmul.f32 %v2497_v7, %v651_v17  ;;  %v485_v11 = vpop.xlane.xlu1 %484  ;;  %v482_v51 = vpop.xlane.xlu0 %481  ;;  %v698_v61 = vmul.f32 %v619_v24, %v2325_v53  ;;  %vm586_vm3 = vweird.f32 %v2493_v2  ;;  %vm2610_vm9 = vmor %vm656_vm14, %vm657_vm2 }
 0x12a   : > { %v623_v30 = vmul.f32 0.5, %v622_v22  ;;  %v458_v32 = vpop.xlane.xlu2 %457  ;;  %v509_v33 = vmul.f32 %v485_v11, %v2308_v36  ;;  %v508_v37 = vmul.f32 %v482_v51, %v2308_v36  ;;  %vm666_vm4 = vweird.f32 %v2495_v4 }
 0x12b   : > { %v544_v38 = vsub.f32 1.5, %v543_v23  ;;  %v653_v42 = vmul.f32 0.5, %v652_v29  ;;  %v500_v45 = vmul.f32 %v458_v32, %v2308_v36  ;;  %vm676_vm5 = vweird.f32 %v2485_v63 }
 0x12c   : > { %v2530_v46 = vpop.eup %2004  ;;  %v2539_v48 = vadd.f32 1e-05, %v509_v33  ;;  %v624_v25 = vsub.f32 1.5, %v623_v30  ;;  %v2558_v28 = vadd.f32 1e-05, %v508_v37  ;;  %v713_v12 = vmul.f32 %v2466_v43, %v694_v19 }
 0x12d   : > { %v2543_v50 = vmul.f32 %v2483_v60, %v544_v38  ;;  %v671_v55 = vmul.f32 %v2530_v46, %v2485_v63  ;;  %v2547_v56 = vpop.eup %2006  ;;  %v654_v35 = vsub.f32 1.5, %v653_v42  ;;  %v2555_v57 = vadd.f32 1e-05, %v500_v45 }
 0x12e   : > { %2010 = vrsqrt.f32 %v2539_v48  ;;  %v2560_v59 = vpop.eup %2008  ;;  %v581_v41 = vmul.f32 %v2547_v56, %v2493_v2  ;;  %v2573_v3 = vmul.f32 %v2488_v1, %v624_v25  ;;  %vm677_vm6 = vweird.f32 %v2530_v46 }
 0x12f   : > { %v672_v62 = vmul.f32 %v2530_v46, %v671_v55  ;;  %v661_v0 = vmul.f32 %v2560_v59, %v2495_v4  ;;  %v549_v9 = vsel %vm2551_vm1, %v2483_v60, %v2543_v50  ;;  %2012 = vrsqrt.f32 %v2555_v57 }
 0x130   : > { %v582_v52 = vmul.f32 %v2547_v56, %v581_v41  ;;  %v655_v60 = vmul.f32 %v2497_v7, %v654_v35  ;;  %2014 = vrsqrt.f32 %v2558_v28  ;;  %v717_v23 = vmul.f32 %v2466_v43, %v698_v61 }
 0x131   : > { %v473_v53 = vpop.xlane.xlu1 %472  ;;  %v470_v16 = vpop.xlane.xlu0 %469  ;;  %v673_v8 = vmul.f32 0.5, %v672_v62  ;;  %v662_v13 = vmul.f32 %v2560_v59, %v661_v0  ;;  %vm587_vm8 = vweird.f32 %v2547_v56  ;;  %v629_v32 = vsel %vm2587_vm7, %v2488_v1, %v2573_v3 }
 0x132   : > { %v497_v21 = vpop.xlane.xlu2 %496  ;;  %v583_v22 = vmul.f32 0.5, %v582_v52  ;;  %v505_v51 = vmul.f32 %v473_v53, %v2308_v36  ;;  %v504_v30 = vmul.f32 %v470_v16, %v2308_v36  ;;  %v732_v42 = vadd.f32 %v2476_v20, %v713_v12  ;;  %vm2637_vm11 = vmor %vm586_vm3, %vm587_vm8 }
 0x133   : > { %v513_v29 = vmul.f32 %v497_v21, %v2308_v36  ;;  %v663_v11 = vmul.f32 0.5, %v662_v13  ;;  %v674_v45 = vsub.f32 1.5, %v673_v8  ;;  %v736_v24 = vadd.f32 %v2476_v20, %v717_v23  ;;  %vm2676_vm3 = vmor %vm676_vm5, %vm677_vm6 }
 0x134   : > { %v2597_v18 = vpop.eup %2010  ;;  %v584_v37 = vsub.f32 1.5, %v583_v22  ;;  %vm667_vm10 = vweird.f32 %v2560_v59  ;;  %1885 = vmatmul.msk.f32.vlgmr.msra.gmra.mxu1 %vm346_vm0, %v732_v42  ;;  %v2626_v55 = vadd.f32 1e-05, %v505_v51  ;;  %v659_v35 = vsel %vm2610_vm9, %v2497_v7, %v655_v60 }
 0x135   : > { %v641_v38 = vmul.f32 %v2597_v18, %v2539_v48  ;;  %v664_v47 = vsub.f32 1.5, %v663_v11  ;;  %v2618_v25 = vadd.f32 1e-05, %v513_v29  ;;  %v2620_v1 = vpop.eup %2012  ;;  %vm556_vm12 = vweird.f32 %v2555_v57  ;;  %1889 = vmatmul.msk.f32.vlgmr.msra.gmra.mxu2 %vm346_vm0, %v736_v24  ;;  %vm2660_vm1 = vmor %vm666_vm4, %vm667_vm10 }
 0x136   : > { %v585_v14 = vmul.f32 %v2547_v56, %v584_v37  ;;  %v2628_v34 = vpop.eup %2014  ;;  %v551_v19 = vmul.f32 %v2620_v1, %v2555_v57  ;;  %vm646_vm13 = vweird.f32 %v2539_v48  ;;  %v2646_v61 = vadd.f32 1e-05, %v504_v30 }
 0x137   : > { %v642_v50 = vmul.f32 %v2597_v18, %v641_v38  ;;  %v665_v7 = vmul.f32 %v2560_v59, %v664_v47  ;;  %vm647_vm14 = vweird.f32 %v2597_v18  ;;  %v631_v2 = vmul.f32 %v2628_v34, %v2558_v28 }
 0x138   : > { %vm636_vm15 = vweird.f32 %v2558_v28  ;;  %v2654_v62 = vmul.f32 %v2530_v46, %v674_v45  ;;  %v552_v3 = vmul.f32 %v2620_v1, %v551_v19  ;;  %2016 = vrsqrt.f32 %v2618_v25  ;;  %vm2737_vm8 = vmor %vm646_vm13, %vm647_vm14 }
 0x139   : > { %v643_v52 = vmul.f32 0.5, %v642_v50  ;;  %v589_v53 = vsel %vm2637_vm11, %v2547_v56, %v585_v14  ;;  %vm557_vm2 = vweird.f32 %v2620_v1  ;;  %v632_v16 = vmul.f32 %v2628_v34, %v631_v2 }
 0x13a   : > { %2018 = vrsqrt.f32 %v2626_v55  ;;  %v553_v17 = vmul.f32 0.5, %v552_v3  ;;  %vm637_vm4 = vweird.f32 %v2628_v34  ;;  %v691_v56 = vmul.f32 %v549_v9, %v2349_v5  ;;  %vm2698_vm5 = vmor %vm556_vm12, %vm557_vm2 }
 0x13b   : > { %2020 = vrsqrt.f32 %v2646_v61  ;;  %v669_v60 = vsel %vm2660_vm1, %v2560_v59, %v665_v7  ;;  %v633_v8 = vmul.f32 0.5, %v632_v16  ;;  %v699_v13 = vmul.f32 %v629_v32, %v2337_v58  ;;  %vm2711_vm6 = vmor %vm636_vm15, %vm637_vm4 }
 0x13c   : > { %v702_v63 = vmul.f32 %v659_v35, %v2328_v54  ;;  %v554_v21 = vsub.f32 1.5, %v553_v17  ;;  %v644_v22 = vsub.f32 1.5, %v643_v52  ;;  %v710_v12 = vmul.f32 %v2466_v43, %v691_v56 }
 0x13d   : > { %v695_v23 = vmul.f32 %v589_v53, %v2358_v10  ;;  %v679_v5 = vsel %vm2676_vm3, %v2530_v46, %v2654_v62  ;;  %v634_v54 = vsub.f32 1.5, %v633_v8  ;;  %v718_v58 = vmul.f32 %v2466_v43, %v699_v13 }
 0x13e   : > { %v721_v9 = vmul.f32 %v2466_v43, %v702_v63  ;;  %v2704_v29 = vpop.eup %2016  ;;  %v555_v10 = vmul.f32 %v2620_v1, %v554_v21  ;;  %v729_v57 = vadd.f32 %v2476_v20, %v710_v12  ;;  %v703_v51 = vmul.f32 %v669_v60, %v2352_v6 }
 0x13f   : > { %v714_v11 = vmul.f32 %v2466_v43, %v695_v23  ;;  %v635_v32 = vmul.f32 %v2628_v34, %v634_v54  ;;  %v681_v33 = vmul.f32 %v2704_v29, %v2618_v25  ;;  %vm686_vm7 = vweird.f32 %v2618_v25 }
 0x140   : > { %v2718_v30 = vpop.eup %2018  ;;  %v737_v28 = vadd.f32 %v2476_v20, %v718_v58  ;;  %v559_v38 = vsel %vm2698_vm5, %v2620_v1, %v555_v10  ;;  %v645_v42 = vmul.f32 %v2597_v18, %v644_v22  ;;  %1882 = vmatmul.msk.f32.gmra.mxu0 %vm346_vm0, %v729_v57  ;;  %v740_v45 = vadd.f32 %v2476_v20, %v721_v9 }
 0x141   : > { %v2021_v37 = vpop.eup %2020  ;;  %v601_v6 = vmul.f32 %v2718_v30, %v2626_v55  ;;  %v639_v24 = vsel %vm2711_vm6, %v2628_v34, %v635_v32  ;;  %v682_v1 = vmul.f32 %v2704_v29, %v681_v33  ;;  %vm606_vm9 = vweird.f32 %v2626_v55  ;;  %v2809_v33 = vld [vmem:[%s3422_s4] ss:$0 sm:$0xff] }
 0x142   : > { %v591_v14 = vmul.f32 %v2021_v37, %v2646_v61  ;;  %1890 = vmatmul.msk.f32.gmra.mxu2 %vm346_vm0, %v737_v28  ;;  %1893 = vmatmul.msk.f32.vlgmr.msra.gmra.mxu3 %vm346_vm0, %v740_v45  ;;  %v733_v48 = vadd.f32 %v2476_v20, %v714_v11  ;;  %v722_v35 = vmul.f32 %v2466_v43, %v703_v51  ;;  %vm596_vm10 = vweird.f32 %v2646_v61 }
 0x143   : > { %v602_v50 = vmul.f32 %v2718_v30, %v601_v6  ;;  %v692_v41 = vmul.f32 %v559_v38, %v2379_v31  ;;  %v683_v19 = vmul.f32 0.5, %v682_v1  ;;  %v700_v7 = vmul.f32 %v639_v24, %v2373_v27 }
 0x144   : > { %v592_v34 = vmul.f32 %v2021_v37, %v591_v14  ;;  %v649_v2 = vsel %vm2737_vm8, %v2597_v18, %v645_v42  ;;  %vm687_vm11 = vweird.f32 %v2704_v29  ;;  %1886 = vmatmul.msk.f32.gmra.mxu1 %vm346_vm0, %v733_v48  ;;  %vm597_vm12 = vweird.f32 %v2021_v37 }
 0x145   : > { %v603_v62 = vmul.f32 0.5, %v602_v50  ;;  %v711_v0 = vmul.f32 %v2466_v43, %v692_v41  ;;  %v684_v3 = vsub.f32 1.5, %v683_v19  ;;  %v719_v31 = vmul.f32 %v2466_v43, %v700_v7  ;;  %vm2768_vm14 = vmor %vm686_vm7, %vm687_vm11 }
 0x146   : > { %v593_v52 = vmul.f32 0.5, %v592_v34  ;;  %vm607_vm13 = vweird.f32 %v2718_v30  ;;  %v741_v27 = vadd.f32 %v2476_v20, %v722_v35  ;;  %v701_v60 = vmul.f32 %v649_v2, %v2391_v39  ;;  %vm598_vm15 = vmor %vm596_vm10, %vm597_vm12 }
 0x147   : > { %v604_v53 = vsub.f32 1.5, %v603_v62  ;;  %v730_v16 = vadd.f32 %v2476_v20, %v711_v0  ;;  %v685_v18 = vmul.f32 %v2704_v29, %v684_v3  ;;  %v738_v56 = vadd.f32 %v2476_v20, %v719_v31  ;;  %vm608_vm1 = vmor %vm606_vm9, %vm607_vm13 }
 0x148   : > { %v594_v17 = vsub.f32 1.5, %v593_v52  ;;  %v704_v8 = vmul.f32 %v679_v5, %v2370_v26  ;;  %v720_v61 = vmul.f32 %v2466_v43, %v701_v60  ;;  %vm1569_vm8 = vcmask 130048  }
 0x149   : > { %1883 = vmatmul.msk.f32.gmra.mxu0 %vm346_vm0, %v730_v16  ;;  %v605_v13 = vmul.f32 %v2718_v30, %v604_v53  ;;  %v689_v39 = vsel %vm2768_vm14, %v2704_v29, %v685_v18 }
 0x14a   : > { %v595_v63 = vmul.f32 %v2021_v37, %v594_v17  ;;  %1891 = vmatmul.msk.f32.gmra.mxu2 %vm346_vm0, %v738_v56  ;;  %1894 = vmatmul.msk.f32.gmra.mxu3 %vm346_vm0, %v741_v27  ;;  %v723_v21 = vmul.f32 %v2466_v43, %v704_v8  ;;  %v705_v55 = vmul.f32 %v689_v39, %v2400_v44 }
 0x14b   : > { %v609_v22 = vsel %vm608_vm1, %v2718_v30, %v605_v13  ;;  %v739_v23 = vadd.f32 %v2476_v20, %v720_v61 }
 0x14c   : > { %v599_v25 = vsel %vm598_vm15, %v2021_v37, %v595_v63  ;;  %v742_v5 = vadd.f32 %v2476_v20, %v723_v21  ;;  %v697_v54 = vmul.f32 %v609_v22, %v2410_v49 }
 0x14d   : > { %v696_v26 = vmul.f32 %v599_v25, %v2394_v40  ;;  %v724_v40 = vmul.f32 %v2466_v43, %v705_v55 }
 0x14e   : > { %v716_v58 = vmul.f32 %v2466_v43, %v697_v54 }
 0x14f   : > { %v715_v12 = vmul.f32 %v2466_v43, %v696_v26  ;;  %v743_v44 = vadd.f32 %v2476_v20, %v724_v40 }
 0x150   : > { %v735_v9 = vadd.f32 %v2476_v20, %v716_v58 }
 0x151   : > { %v734_v59 = vadd.f32 %v2476_v20, %v715_v12 }
 0x152   : > { %1892 = vmatmul.msk.f32.gmra.mxu2 %vm346_vm0, %v739_v23  ;;  %1895 = vmatmul.msk.f32.gmra.mxu3 %vm346_vm0, %v742_v5 }
 0x153   : > { %1887 = vmatmul.msk.f32.gmra.mxu1 %vm346_vm0, %v734_v59 }
 0x15a   : > { %1896 = vmatmul.msk.f32.gmra.mxu3 %vm346_vm0, %v743_v44 }
 0x15b   : > { %1888 = vmatmul.msk.f32.gmra.mxu1 %vm346_vm0, %v735_v9 }
 0x18c   : > { %v461_v29 = vpop.xlane.xlu0 %460 }
 0x18d   : > { %v501_v49 = vmul.f32 %v461_v29, %v2308_v36 }
 0x18f   : > { %v517_v10 = vadd.f32 1e-05, %v501_v49 }
 0x191   : > { %2022 = vrsqrt.f32 %v517_v10  ;;  %vm566_vm3 = vweird.f32 %v517_v10 }
 0x197   : > { %v2023_v46 = vpop.eup %2022 }
 0x198   : > { %v561_v57 = vmul.f32 %v2023_v46, %v517_v10  ;;  %vm567_vm2 = vweird.f32 %v2023_v46 }
 0x199   : > { %vm568_vm4 = vmor %vm566_vm3, %vm567_vm2 }
 0x19a   : > { %v562_v11 = vmul.f32 %v2023_v46, %v561_v57 }
 0x19c   : > { %v563_v51 = vmul.f32 0.5, %v562_v11 }
 0x19e   : > { %v564_v30 = vsub.f32 1.5, %v563_v51 }
 0x1a0   : > { %v565_v32 = vmul.f32 %v2023_v46, %v564_v30 }
 0x1a2   : > { %v569_v28 = vsel %vm568_vm4, %v2023_v46, %v565_v32 }
 0x1a3   : > { %v817_v37 = vpop.f32.mrf.mxu0  ;;  %v693_v36 = vmul.f32 %v569_v28, %v2436_v15 }
 0x1a4   : > { %v2813_v38 = vadd.f32 %v2809_v33, %v817_v37 }
 0x1a5   : > { %v712_v42 = vmul.f32 %v2466_v43, %v693_v36 }
 0x1a6   : > { %v881_v6 = vmul.f32 0.70710677, %v2813_v38 }
 0x1a7   : > { %v731_v45 = vadd.f32 %v2476_v20, %v712_v42 }
 0x1a8   : > { %v897_v47 = vmul.f32 %v881_v6, %v881_v6 }
 0x1a9   : > { %1884 = vmatmul.msk.f32.gmra.mxu0 %vm346_vm0, %v731_v45 }
 0x1aa   : > { %v898_v24 = vmin.f32 %v897_v47, 16.0 }
 0x1ac   : > { %v899_v1 = vmul.f32 2.1237322e-06, %v898_v24  ;;  %v910_v14 = vmul.f32 3.8918573e-05, %v898_v24 }
 0x1ae   : > { %v900_v50 = vadd.f32 0.00028619796, %v899_v1  ;;  %v911_v48 = vadd.f32 0.001143296, %v910_v14 }
 0x1b0   : > { %v901_v35 = vmul.f32 %v900_v50, %v898_v24  ;;  %v912_v41 = vmul.f32 %v911_v48, %v898_v24 }
 0x1b1   : > { %v829_v2 = vpop.f32.mrf.mxu1 }
 0x1b2   : > { %v902_v15 = vadd.f32 0.0036580483, %v901_v35  ;;  %v913_v19 = vadd.f32 0.014752088, %v912_v41  ;;  %v2820_v43 = vadd.f32 %v2809_v33, %v829_v2 }
 0x1b4   : > { %v903_v34 = vmul.f32 %v902_v15, %v898_v24  ;;  %v914_v7 = vmul.f32 %v913_v19, %v898_v24  ;;  %v2823_v0 = vmul.f32 0.70710677, %v2820_v43 }
 0x1b6   : > { %v904_v62 = vadd.f32 0.05243302, %v903_v34  ;;  %v915_v20 = vadd.f32 0.112945676, %v914_v7  ;;  %v1057_v31 = vmul.f32 %v2823_v0, %v2823_v0 }
 0x1b8   : > { %v905_v3 = vmul.f32 %v904_v62, %v898_v24  ;;  %v916_v52 = vmul.f32 %v915_v20, %v898_v24  ;;  %v1058_v16 = vmin.f32 %v1057_v31, 16.0  ;;  %v841_v18 = vpop.f32.mrf.mxu2 }
 0x1b9   : > { %v2828_v17 = vadd.f32 %v2809_v33, %v841_v18 }
 0x1ba   : > { %v906_v53 = vadd.f32 0.18741608, %v905_v3  ;;  %v917_v27 = vadd.f32 0.4994258, %v916_v52  ;;  %v1059_v56 = vmul.f32 2.1237322e-06, %v1058_v16 }
 0x1bb   : > { %v1070_v60 = vmul.f32 3.8918573e-05, %v1058_v16  ;;  %v2831_v63 = vmul.f32 0.70710677, %v2828_v17  ;;  %v2899_v51 = vmul.f32 0.5, %v2828_v17 }
 0x1bc   : > { %v918_v4 = vmul.f32 %v917_v27, %v898_v24  ;;  %v907_v8 = vmul.f32 %v906_v53, %v898_v24  ;;  %v1060_v39 = vadd.f32 0.00028619796, %v1059_v56 }
 0x1bd   : > { %v1071_v25 = vadd.f32 0.001143296, %v1070_v60  ;;  %v820_v61 = vpop.f32.mrf.mxu0  ;;  %v1217_v22 = vmul.f32 %v2831_v63, %v2831_v63 }
 0x1be   : > { %v919_v13 = vadd.f32 1.0, %v918_v4  ;;  %v1061_v21 = vmul.f32 %v1060_v39, %v1058_v16  ;;  %v908_v12 = vadd.f32 1.1283791, %v907_v8  ;;  %v2836_v23 = vadd.f32 %v2809_v33, %v820_v61 }
 0x1bf   : > { %v1072_v26 = vmul.f32 %v1071_v25, %v1058_v16  ;;  %v2838_v54 = vmin.f32 %v1217_v22, 16.0  ;;  %v2878_v22 = vmul.f32 0.5, %v2820_v43 }
 0x1c0   : > { %2024 = vrcp.f32 %v919_v13  ;;  %v929_v55 = vand.u32 2147483647, %v919_v13  ;;  %v1062_v5 = vadd.f32 0.0036580483, %v1061_v21  ;;  %v931_v40 = vand.u32 2147483648, %v919_v13 }
 0x1c1   : > { %v1073_v59 = vadd.f32 0.014752088, %v1072_v26  ;;  %v2841_v58 = vmul.f32 0.70710677, %v2836_v23  ;;  %v1219_v29 = vmul.f32 2.1237322e-06, %v2838_v54  ;;  %v909_v46 = vmul.f32 %v908_v12, %v881_v6  ;;  %v832_v35 = vpop.f32.mrf.mxu1 }
 0x1c2   : > { %v1063_v44 = vmul.f32 %v1062_v5, %v1058_v16  ;;  %v1230_v49 = vmul.f32 3.8918573e-05, %v2838_v54  ;;  %vm2847_vm0 = vcmp.eq.f32.partialorder %v929_v55, 8.507059e+37  ;;  %v932_v28 = vor.u32 1.1754944e-38, %v931_v40 }
 0x1c3   : > { %v1074_v9 = vmul.f32 %v1073_v59, %v1058_v16  ;;  %v937_v57 = vmul.f32 %v2841_v58, %v2841_v58  ;;  %v1220_v37 = vadd.f32 0.00028619796, %v1219_v29  ;;  %vm925_vm6 = vweird.f32 %v919_v13 }
 0x1c4   : > { %v1064_v30 = vadd.f32 0.05243302, %v1063_v44  ;;  %v1231_v36 = vadd.f32 0.001143296, %v1230_v49  ;;  %v2861_v31 = vadd.f32 %v2809_v33, %v832_v35  ;;  %v865_v21 = vmul.f32 0.5, %v2813_v38 }
 0x1c5   : > { %v1075_v32 = vadd.f32 0.112945676, %v1074_v9  ;;  %v2851_v42 = vmin.f32 %v937_v57, 16.0  ;;  %v844_v45 = vpop.f32.mrf.mxu2  ;;  %v1221_v1 = vmul.f32 %v1220_v37, %v2838_v54  ;;  %v853_v9 = vpop.f32.mrf.mxu3 }
 0x1c6   : > { %v2025_v10 = vpop.eup %2024  ;;  %v1065_v24 = vmul.f32 %v1064_v30, %v1058_v16  ;;  %v1232_v14 = vmul.f32 %v1231_v36, %v2838_v54  ;;  %v2858_v34 = vadd.f32 %v2809_v33, %v844_v45  ;;  %v2883_v5 = vmul.f32 0.70710677, %v2861_v31 }
 0x1c7   : > { %v921_v11 = vmul.f32 %v2025_v10, %v919_v13  ;;  %vm926_vm5 = vweird.f32 %v2025_v10  ;;  %v1076_v6 = vmul.f32 %v1075_v32, %v1058_v16  ;;  %v939_v50 = vmul.f32 2.1237322e-06, %v2851_v42 }
 0x1c8   : > { %v950_v48 = vmul.f32 3.8918573e-05, %v2851_v42  ;;  %v1066_v15 = vadd.f32 0.18741608, %v1065_v24  ;;  %v1222_v7 = vadd.f32 0.0036580483, %v1221_v1  ;;  %vm927_vm7 = vmor %vm925_vm6, %vm926_vm5 }
 0x1c9   : > { %v922_v47 = vsub.f32 1.0, %v921_v11  ;;  %v1077_v19 = vadd.f32 0.4994258, %v1076_v6  ;;  %v1233_v2 = vadd.f32 0.014752088, %v1232_v14 }
 0x1ca   : > { %v940_v62 = vadd.f32 0.00028619796, %v939_v50  ;;  %v951_v52 = vadd.f32 0.001143296, %v950_v48  ;;  %v1067_v53 = vmul.f32 %v1066_v15, %v1058_v16  ;;  %v1223_v27 = vmul.f32 %v1222_v7, %v2838_v54 }
 0x1cb   : > { %v923_v41 = vmul.f32 %v2025_v10, %v922_v47  ;;  %v1078_v3 = vmul.f32 %v1077_v19, %v1058_v16  ;;  %v1234_v18 = vmul.f32 %v1233_v2, %v2838_v54  ;;  %v2871_v13 = vmul.f32 0.70710677, %v2858_v34 }
 0x1cc   : > { %v941_v4 = vmul.f32 %v940_v62, %v2851_v42  ;;  %v952_v8 = vmul.f32 %v951_v52, %v2851_v42  ;;  %v1224_v25 = vadd.f32 0.05243302, %v1223_v27  ;;  %v1068_v29 = vadd.f32 1.1283791, %v1067_v53 }
 0x1cd   : > { %v924_v20 = vadd.f32 %v2025_v10, %v923_v41  ;;  %v2867_v60 = vadd.f32 1.0, %v1078_v3  ;;  %v1235_v61 = vadd.f32 0.112945676, %v1234_v18  ;;  %v1257_v38 = vmul.f32 %v2871_v13, %v2871_v13 }
 0x1ce   : > { %v942_v16 = vadd.f32 0.0036580483, %v941_v4  ;;  %v1225_v12 = vmul.f32 %v1224_v25, %v2838_v54  ;;  %v953_v44 = vadd.f32 0.014752088, %v952_v8  ;;  %v1069_v14 = vmul.f32 %v1068_v29, %v2823_v0 }
 0x1cf   : > { %v928_v56 = vsel %vm927_vm7, %v2025_v10, %v924_v20  ;;  %2026 = vrcp.f32 %v2867_v60  ;;  %v1236_v55 = vmul.f32 %v1235_v61, %v2838_v54  ;;  %v2889_v11 = vmin.f32 %v1257_v38, 16.0 }
 0x1d0   : > { %v933_v39 = vsel %vm2847_vm0, %v932_v28, %v928_v56  ;;  %v943_v40 = vmul.f32 %v942_v16, %v2851_v42  ;;  %v1226_v49 = vadd.f32 0.18741608, %v1225_v12  ;;  %v954_v57 = vmul.f32 %v953_v44, %v2851_v42 }
 0x1d1   : > { %v934_v26 = vmul.f32 %v933_v39, %v909_v46  ;;  %v1237_v43 = vadd.f32 0.4994258, %v1236_v55  ;;  %v2904_v28 = vadd.f32 %v2809_v33, %v853_v9  ;;  %v1259_v24 = vmul.f32 2.1237322e-06, %v2889_v11 }
 0x1d2   : > { %v944_v46 = vadd.f32 0.05243302, %v943_v40  ;;  %v1227_v30 = vmul.f32 %v1226_v49, %v2838_v54  ;;  %v955_v47 = vadd.f32 0.112945676, %v954_v57  ;;  %v1089_v17 = vand.u32 2147483647, %v2867_v60  ;;  %v856_v57 = vpop.f32.mrf.mxu3 }
 0x1d3   : > { %v1897_v59 = vclamps-f32 %v934_v26, 1.0  ;;  %v1238_v32 = vmul.f32 %v1237_v43, %v2838_v54  ;;  %v1097_v54 = vmul.f32 %v2883_v5, %v2883_v5  ;;  %v1260_v35 = vadd.f32 0.00028619796, %v1259_v24 }
 0x1d4   : > { %v945_v45 = vmul.f32 %v944_v46, %v2851_v42  ;;  %v956_v48 = vmul.f32 %v955_v47, %v2851_v42  ;;  %vm1085_vm9 = vweird.f32 %v2867_v60  ;;  %v2924_v15 = vmul.f32 0.70710677, %v2904_v28 }
 0x1d5   : > { %v1537_v10 = vadd.f32 1.0, %v1897_v59  ;;  %v2027_v37 = vpop.eup %2026  ;;  %v2912_v1 = vadd.f32 1.0, %v1238_v32  ;;  %v1091_v19 = vand.u32 2147483648, %v2867_v60  ;;  %v1228_v7 = vadd.f32 1.1283791, %v1227_v30 }
 0x1d6   : > { %v1081_v6 = vmul.f32 %v2027_v37, %v2867_v60  ;;  %v946_v50 = vadd.f32 0.18741608, %v945_v45  ;;  %vm1086_vm10 = vweird.f32 %v2027_v37  ;;  %v957_v20 = vadd.f32 0.4994258, %v956_v48 }
 0x1d7   : > { %v2906_v36 = vmul.f32 %v1537_v10, %v865_v21  ;;  %2028 = vrcp.f32 %v2912_v1  ;;  %v1249_v0 = vand.u32 2147483647, %v2912_v1  ;;  %v1261_v3 = vmul.f32 %v1260_v35, %v2889_v11  ;;  %vm1087_vm12 = vmor %vm1085_vm9, %vm1086_vm10 }
 0x1d8   : > { %v1082_v41 = vsub.f32 1.0, %v1081_v6  ;;  %v947_v2 = vmul.f32 %v946_v50, %v2851_v42  ;;  %vm2930_vm11 = vcmp.eq.f32.partialorder %v1089_v17, 8.507059e+37  ;;  %v1251_v53 = vand.u32 2147483648, %v2912_v1 }
 0x1d9   : > { %1570 = vst.msk [vmem:[%s2896_s20] sm:$0xff] %vm1569_vm8, %v2906_v36  ;;  %v1270_v18 = vmul.f32 3.8918573e-05, %v2889_v11  ;;  %v958_v56 = vmul.f32 %v957_v20, %v2851_v42  ;;  %v1262_v8 = vadd.f32 0.0036580483, %v1261_v3  ;;  %v1377_v39 = vmul.f32 %v2924_v15, %v2924_v15 }
 0x1da   : > { %v1083_v62 = vmul.f32 %v2027_v37, %v1082_v41  ;;  %v948_v27 = vadd.f32 1.1283791, %v947_v2  ;;  %v1092_v25 = vor.u32 1.1754944e-38, %v1091_v19  ;;  %v1229_v61 = vmul.f32 %v1228_v7, %v2831_v63 }
 0x1db   : > { %vm1245_vm13 = vweird.f32 %v2912_v1  ;;  %v1271_v16 = vadd.f32 0.001143296, %v1270_v18  ;;  %v2944_v12 = vadd.f32 1.0, %v958_v56  ;;  %v1263_v42 = vmul.f32 %v1262_v8, %v2889_v11 }
 0x1dc   : > { %v1084_v4 = vadd.f32 %v2027_v37, %v1083_v62  ;;  %v2947_v55 = vmin.f32 %v1377_v39, 16.0  ;;  %vm2952_vm14 = vcmp.eq.f32.partialorder %v1249_v0, 8.507059e+37  ;;  %v1252_v63 = vor.u32 1.1754944e-38, %v1251_v53 }
 0x1dd   : > { %v2029_v21 = vpop.eup %2028  ;;  %v1272_v44 = vmul.f32 %v1271_v16, %v2889_v11  ;;  %v2958_v9 = vmul.f32 %v948_v27, %v2841_v58  ;;  %2030 = vrcp.f32 %v2944_v12  ;;  %v969_v29 = vand.u32 2147483647, %v2944_v12 }
 0x1de   : > { %v1088_v26 = vsel %vm1087_vm12, %v2027_v37, %v1084_v4  ;;  %v1241_v60 = vmul.f32 %v2029_v21, %v2912_v1  ;;  %v1264_v43 = vadd.f32 0.05243302, %v1263_v42  ;;  %v2962_v46 = vmin.f32 %v1097_v54, 16.0 }
 0x1df   : > { %v1093_v59 = vsel %vm2930_vm11, %v1092_v25, %v1088_v26  ;;  %v1273_v10 = vadd.f32 0.014752088, %v1272_v44  ;;  %vm1246_vm15 = vweird.f32 %v2029_v21  ;;  %v1379_v32 = vmul.f32 2.1237322e-06, %v2947_v55 }
 0x1e0   : > { %v1094_v38 = vmul.f32 %v1093_v59, %v1069_v14  ;;  %v1242_v49 = vsub.f32 1.0, %v1241_v60  ;;  %v1390_v37 = vmul.f32 3.8918573e-05, %v2947_v55  ;;  %v971_v58 = vand.u32 2147483648, %v2944_v12  ;;  %vm1247_vm2 = vmor %vm1245_vm13, %vm1246_vm15 }
 0x1e1   : > { %v1265_v47 = vmul.f32 %v1264_v43, %v2889_v11  ;;  %v1274_v24 = vmul.f32 %v1273_v10, %v2889_v11  ;;  %v1380_v17 = vadd.f32 0.00028619796, %v1379_v32  ;;  %v2970_v54 = vadd.f32 %v2809_v33, %v856_v57 }
 0x1e2   : > { %v1901_v30 = vclamps-f32 %v1094_v38, 1.0  ;;  %v1243_v45 = vmul.f32 %v2029_v21, %v1242_v49  ;;  %v1391_v14 = vadd.f32 0.001143296, %v1390_v37  ;;  %vm965_vm1 = vweird.f32 %v2944_v12 }
 0x1e3   : > { %v1275_v48 = vadd.f32 0.112945676, %v1274_v24  ;;  %v1099_v35 = vmul.f32 2.1237322e-06, %v2962_v46  ;;  %v2031_v41 = vpop.eup %2030  ;;  %v1381_v7 = vmul.f32 %v1380_v17, %v2947_v55  ;;  %v1110_v62 = vmul.f32 3.8918573e-05, %v2962_v46 }
 0x1e4   : > { %v1541_v6 = vadd.f32 1.0, %v1901_v30  ;;  %v1244_v50 = vadd.f32 %v2029_v21, %v1243_v45  ;;  %v1392_v2 = vmul.f32 %v1391_v14, %v2947_v55  ;;  %v961_v20 = vmul.f32 %v2031_v41, %v2944_v12 }
 0x1e5   : > { %vm2982_vm3 = vcmp.eq.f32.partialorder %v969_v29, 8.507059e+37  ;;  %v972_v52 = vor.u32 1.1754944e-38, %v971_v58  ;;  %v1266_v53 = vadd.f32 0.18741608, %v1265_v47  ;;  %v1276_v1 = vmul.f32 %v1275_v48, %v2889_v11 }
 0x1e6   : > { %v1557_v19 = vmul.f32 %v1541_v6, %v2878_v22  ;;  %v1248_v0 = vsel %vm1247_vm2, %v2029_v21, %v1244_v50  ;;  %v1382_v27 = vadd.f32 0.0036580483, %v1381_v7  ;;  %v1393_v18 = vadd.f32 0.014752088, %v1392_v2 }
 0x1e7   : > { %v1253_v22 = vsel %vm2952_vm14, %v1252_v63, %v1248_v0  ;;  %v962_v56 = vsub.f32 1.0, %v961_v20  ;;  %vm966_vm4 = vweird.f32 %v2031_v41  ;;  %v1100_v8 = vadd.f32 0.00028619796, %v1099_v35 }
 0x1e8   : > { %1574 = vst.msk [vmem:[%s2896_s20 + $0x20] sm:$0xff] %vm1569_vm8, %v1557_v19  ;;  %v1254_v4 = vmul.f32 %v1253_v22, %v1229_v61  ;;  %v1277_v39 = vadd.f32 0.4994258, %v1276_v1  ;;  %v1383_v25 = vmul.f32 %v1382_v27, %v2947_v55  ;;  %v1394_v16 = vmul.f32 %v1393_v18, %v2947_v55  ;;  %vm967_vm0 = vmor %vm965_vm1, %vm966_vm4 }
 0x1e9   : > { %v1111_v21 = vadd.f32 0.001143296, %v1110_v62  ;;  %v963_v42 = vmul.f32 %v2031_v41, %v962_v56  ;;  %v1267_v59 = vmul.f32 %v1266_v53, %v2889_v11  ;;  %v1101_v60 = vmul.f32 %v1100_v8, %v2962_v46 }
 0x1ea   : > { %v1905_v26 = vclamps-f32 %v1254_v4, 1.0  ;;  %v1278_v40 = vmul.f32 %v1277_v39, %v2889_v11  ;;  %v1384_v63 = vadd.f32 0.05243302, %v1383_v25  ;;  %v1395_v44 = vadd.f32 0.112945676, %v1394_v16 }
 0x1eb   : > { %v1112_v61 = vmul.f32 %v1111_v21, %v2962_v46  ;;  %v964_v29 = vadd.f32 %v2031_v41, %v963_v42  ;;  %v1102_v49 = vadd.f32 0.0036580483, %v1101_v60  ;;  %v2998_v43 = vmul.f32 0.70710677, %v2970_v54  ;;  %v847_v21 = vpop.f32.mrf.mxu2 }
 0x1ec   : > { %v1545_v38 = vadd.f32 1.0, %v1905_v26  ;;  %v3003_v10 = vadd.f32 1.0, %v1278_v40  ;;  %v1385_v57 = vmul.f32 %v1384_v63, %v2947_v55  ;;  %v1396_v11 = vmul.f32 %v1395_v44, %v2947_v55 }
 0x1ed   : > { %v1113_v30 = vadd.f32 0.014752088, %v1112_v61  ;;  %v968_v37 = vsel %vm967_vm0, %v2031_v41, %v964_v29  ;;  %v1103_v45 = vmul.f32 %v1102_v49, %v2962_v46  ;;  %v1417_v58 = vmul.f32 %v2998_v43, %v2998_v43 }
 0x1ee   : > { %v1561_v32 = vmul.f32 %v1545_v38, %v2899_v51  ;;  %v973_v47 = vsel %vm2982_vm3, %v972_v52, %v968_v37  ;;  %2032 = vrcp.f32 %v3003_v10  ;;  %v1397_v24 = vadd.f32 0.4994258, %v1396_v11 }
 0x1ef   : > { %v974_v12 = vmul.f32 %v973_v47, %v2958_v9  ;;  %v1386_v6 = vadd.f32 0.18741608, %v1385_v57  ;;  %v1104_v17 = vadd.f32 0.05243302, %v1103_v45  ;;  %v1114_v51 = vmul.f32 %v1113_v30, %v2962_v46 }
 0x1f0   : > { %1578 = vst.msk [vmem:[%s2896_s20 + $0x40] sm:$0xff] %vm1569_vm8, %v1561_v32  ;;  %v3018_v14 = vmin.f32 %v1417_v58, 16.0  ;;  %v866_v50 = vmul.f32 0.5, %v2836_v23  ;;  %v1268_v35 = vadd.f32 1.1283791, %v1267_v59  ;;  %v1398_v41 = vmul.f32 %v1397_v24, %v2947_v55  ;;  %v823_v23 = vpop.f32.mrf.mxu0 }
 0x1f1   : > { %v1898_v48 = vclamps-f32 %v974_v12, 1.0  ;;  %v1105_v19 = vmul.f32 %v1104_v17, %v2962_v46  ;;  %v1115_v7 = vadd.f32 0.112945676, %v1114_v51  ;;  %v3026_v0 = vmul.f32 0.5, %v2858_v34 }
 0x1f2   : > { %v1419_v2 = vmul.f32 2.1237322e-06, %v3018_v14  ;;  %v1430_v9 = vmul.f32 3.8918573e-05, %v3018_v14  ;;  %v1289_v20 = vand.u32 2147483647, %v3003_v10  ;;  %v1387_v53 = vmul.f32 %v1386_v6, %v2947_v55 }
 0x1f3   : > { %v1538_v62 = vadd.f32 1.0, %v1898_v48  ;;  %v3029_v3 = vadd.f32 1.0, %v1398_v41  ;;  %v1116_v22 = vmul.f32 %v1115_v7, %v2962_v46  ;;  %v1269_v4 = vmul.f32 %v1268_v35, %v2871_v13 }
 0x1f4   : > { %v2033_v52 = vpop.eup %2032  ;;  %v1420_v1 = vadd.f32 0.00028619796, %v1419_v2  ;;  %v1431_v27 = vadd.f32 0.001143296, %v1430_v9  ;;  %v3036_v34 = vmul.f32 0.5, %v2904_v28  ;;  %vm1285_vm5 = vweird.f32 %v3003_v10 }
 0x1f5   : > { %v1554_v18 = vmul.f32 %v1538_v62, %v866_v50  ;;  %v1281_v56 = vmul.f32 %v2033_v52, %v3003_v10  ;;  %2034 = vrcp.f32 %v3029_v3  ;;  %v1106_v8 = vadd.f32 0.18741608, %v1105_v19 }
 0x1f6   : > { %v3041_v39 = vadd.f32 %v2809_v33, %v823_v23  ;;  %v1291_v25 = vand.u32 2147483648, %v3003_v10  ;;  %v1117_v16 = vadd.f32 0.4994258, %v1116_v22  ;;  %v1421_v13 = vmul.f32 %v1420_v1, %v3018_v14 }
 0x1f7   : > { %1571 = vst.msk [vmem:[%s2896_s20 + $0x8] sm:$0xff] %vm1569_vm8, %v1554_v18  ;;  %v1282_v55 = vsub.f32 1.0, %v1281_v56  ;;  %vm1286_vm6 = vweird.f32 %v2033_v52  ;;  %vm3047_vm7 = vcmp.eq.f32.partialorder %v1289_v20, 8.507059e+37  ;;  %v1388_v26 = vadd.f32 1.1283791, %v1387_v53 }
 0x1f8   : > { %v1432_v42 = vmul.f32 %v1431_v27, %v3018_v14  ;;  %v1409_v60 = vand.u32 2147483647, %v3029_v3  ;;  %v1118_v40 = vmul.f32 %v1117_v16, %v2962_v46  ;;  %v1422_v63 = vadd.f32 0.0036580483, %v1421_v13  ;;  %vm1287_vm9 = vmor %vm1285_vm5, %vm1286_vm6 }
 0x1f9   : > { %v1283_v59 = vmul.f32 %v2033_v52, %v1282_v55  ;;  %v1107_v44 = vmul.f32 %v1106_v8, %v2962_v46  ;;  %v3056_v38 = vmul.f32 0.70710677, %v3041_v39  ;;  %v3059_v29 = vadd.f32 %v2809_v33, %v847_v21 }
 0x1fa   : > { %v1433_v61 = vadd.f32 0.014752088, %v1432_v42  ;;  %v1292_v57 = vor.u32 1.1754944e-38, %v1291_v25  ;;  %v3061_v11 = vadd.f32 1.0, %v1118_v40  ;;  %v1423_v30 = vmul.f32 %v1422_v63, %v3018_v14 }
 0x1fb   : > { %v1284_v49 = vadd.f32 %v2033_v52, %v1283_v59  ;;  %v2035_v32 = vpop.eup %2034  ;;  %v1389_v46 = vmul.f32 %v1388_v26, %v2924_v15  ;;  %v977_v45 = vmul.f32 %v3056_v38, %v3056_v38  ;;  %v3072_v58 = vmul.f32 0.70710677, %v3059_v29 }
 0x1fc   : > { %v1434_v37 = vmul.f32 %v1433_v61, %v3018_v14  ;;  %v1401_v12 = vmul.f32 %v2035_v32, %v3029_v3  ;;  %vm1405_vm10 = vweird.f32 %v3029_v3  ;;  %2036 = vrcp.f32 %v3061_v11 }
 0x1fd   : > { %v1288_v47 = vsel %vm1287_vm9, %v2033_v52, %v1284_v49  ;;  %vm3079_vm11 = vcmp.eq.f32.partialorder %v1409_v60, 8.507059e+37  ;;  %v1411_v24 = vand.u32 2147483648, %v3029_v3  ;;  %v1108_v6 = vadd.f32 1.1283791, %v1107_v44  ;;  %v859_v60 = vpop.f32.mrf.mxu3 }
 0x1fe   : > { %v1293_v10 = vsel %vm3047_vm7, %v1292_v57, %v1288_v47  ;;  %v1402_v51 = vsub.f32 1.0, %v1401_v12  ;;  %v1424_v50 = vadd.f32 0.05243302, %v1423_v30  ;;  %v1435_v48 = vadd.f32 0.112945676, %v1434_v37 }
 0x1ff   : > { %v1294_v17 = vmul.f32 %v1293_v10, %v1269_v4  ;;  %vm1406_vm12 = vweird.f32 %v2035_v32  ;;  %v1129_v35 = vand.u32 2147483647, %v3061_v11  ;;  %v3085_v41 = vmin.f32 %v977_v45, 16.0 }
 0x200   : > { %v1297_v19 = vmul.f32 %v3072_v58, %v3072_v58  ;;  %v1403_v2 = vmul.f32 %v2035_v32, %v1402_v51  ;;  %v1425_v9 = vmul.f32 %v1424_v50, %v3018_v14  ;;  %v1436_v62 = vmul.f32 %v1435_v48, %v3018_v14  ;;  %vm1407_vm13 = vmor %vm1405_vm10, %vm1406_vm12 }
 0x201   : > { %v1906_v7 = vclamps-f32 %v1294_v17, 1.0  ;;  %v1412_v20 = vor.u32 1.1754944e-38, %v1411_v24  ;;  %v979_v23 = vmul.f32 2.1237322e-06, %v3085_v41  ;;  %v990_v52 = vmul.f32 3.8918573e-05, %v3085_v41 }
 0x202   : > { %v3093_v53 = vmin.f32 %v1297_v19, 16.0  ;;  %v2037_v22 = vpop.eup %2036  ;;  %v1404_v27 = vadd.f32 %v2035_v32, %v1403_v2  ;;  %v1426_v18 = vadd.f32 0.18741608, %v1425_v9  ;;  %v1437_v4 = vadd.f32 0.4994258, %v1436_v62 }
 0x203   : > { %v1546_v1 = vadd.f32 1.0, %v1906_v7  ;;  %v1121_v56 = vmul.f32 %v2037_v22, %v3061_v11  ;;  %v1131_v8 = vand.u32 2147483648, %v3061_v11  ;;  %v980_v55 = vadd.f32 0.00028619796, %v979_v23  ;;  %v835_v7 = vpop.f32.mrf.mxu1 }
 0x204   : > { %v991_v25 = vadd.f32 0.001143296, %v990_v52  ;;  %v1408_v13 = vsel %vm1407_vm13, %v2035_v32, %v1404_v27  ;;  %v1427_v21 = vmul.f32 %v1426_v18, %v3018_v14  ;;  %v1438_v28 = vmul.f32 %v1437_v4, %v3018_v14 }
 0x205   : > { %v1562_v16 = vmul.f32 %v1546_v1, %v3026_v0  ;;  %v1413_v26 = vsel %vm3079_vm11, %v1412_v20, %v1408_v13  ;;  %v1122_v42 = vsub.f32 1.0, %v1121_v56  ;;  %v981_v3 = vmul.f32 %v980_v55, %v3085_v41 }
 0x206   : > { %v992_v59 = vmul.f32 %v991_v25, %v3085_v41  ;;  %v1414_v40 = vmul.f32 %v1413_v26, %v1389_v46  ;;  %vm1126_vm14 = vweird.f32 %v2037_v22  ;;  %v3109_v63 = vadd.f32 1.0, %v1438_v28 }
 0x207   : > { %1579 = vst.msk [vmem:[%s2896_s20 + $0x48] sm:$0xff] %vm1569_vm8, %v1562_v16  ;;  %v1299_v0 = vmul.f32 2.1237322e-06, %v3093_v53  ;;  %v1123_v44 = vmul.f32 %v2037_v22, %v1122_v42  ;;  %v982_v61 = vadd.f32 0.0036580483, %v981_v3  ;;  %vm1125_vm15 = vweird.f32 %v3061_v11 }
 0x208   : > { %v993_v14 = vadd.f32 0.014752088, %v992_v59  ;;  %v1310_v49 = vmul.f32 3.8918573e-05, %v3093_v53  ;;  %v1909_v57 = vclamps-f32 %v1414_v40, 1.0  ;;  %2038 = vrcp.f32 %v3109_v63  ;;  %vm1127_vm1 = vmor %vm1125_vm15, %vm1126_vm14  ;;  %v850_v59 = vpop.f32.mrf.mxu2 }
 0x209   : > { %v3116_v30 = vadd.f32 %v2809_v33, %v859_v60  ;;  %v1124_v32 = vadd.f32 %v2037_v22, %v1123_v44  ;;  %v1132_v46 = vor.u32 1.1754944e-38, %v1131_v8  ;;  %v1428_v37 = vadd.f32 1.1283791, %v1427_v21 }
 0x20a   : > { %v983_v45 = vmul.f32 %v982_v61, %v3085_v41  ;;  %v1549_v47 = vadd.f32 1.0, %v1909_v57  ;;  %v994_v12 = vmul.f32 %v993_v14, %v3085_v41  ;;  %v1300_v10 = vadd.f32 0.00028619796, %v1299_v0 }
 0x20b   : > { %v1311_v15 = vadd.f32 0.001143296, %v1310_v49  ;;  %v1109_v11 = vmul.f32 %v1108_v6, %v2883_v5  ;;  %v1128_v24 = vsel %vm1127_vm1, %v2037_v22, %v1124_v32  ;;  %vm1130_vm2 = vcmp.eq.f32.partialorder %v1129_v35, 8.507059e+37 }
 0x20c   : > { %v984_v17 = vadd.f32 0.05243302, %v983_v45  ;;  %v1565_v51 = vmul.f32 %v1549_v47, %v3036_v34  ;;  %v1133_v50 = vsel %vm1130_vm2, %v1132_v46, %v1128_v24  ;;  %v995_v48 = vadd.f32 0.112945676, %v994_v12 }
 0x20d   : > { %v1301_v19 = vmul.f32 %v1300_v10, %v3093_v53  ;;  %vm1687_vm3 = vcmask 261248   ;;  %v870_v2 = vmul.f32 0.5, %v2861_v31  ;;  %v1134_v9 = vmul.f32 %v1133_v50, %v1109_v11 }
 0x20e   : > { %v1312_v62 = vmul.f32 %v1311_v15, %v3093_v53  ;;  %v3127_v20 = vmul.f32 0.70710677, %v3116_v30  ;;  %v2039_v5 = vpop.eup %2038  ;;  %1582 = vst.msk [vmem:[%s2896_s20 + $0x60] sm:$0xff] %vm1569_vm8, %v1565_v51  ;;  %v1429_v6 = vmul.f32 %v1428_v37, %v2998_v43  ;;  %v985_v34 = vmul.f32 %v984_v17, %v3085_v41 }
 0x20f   : > { %v996_v35 = vmul.f32 %v995_v48, %v3085_v41  ;;  %v1302_v23 = vadd.f32 0.0036580483, %v1301_v19  ;;  %v1902_v52 = vclamps-f32 %v1134_v9, 1.0  ;;  %v1441_v22 = vmul.f32 %v2039_v5, %v3109_v63 }
 0x210   : > { %v1449_v31 = vand.u32 2147483647, %v3109_v63  ;;  %v3137_v1 = vadd.f32 %v2809_v33, %v835_v7  ;;  %v1313_v4 = vadd.f32 0.014752088, %v1312_v62  ;;  %v1457_v43 = vmul.f32 %v3127_v20, %v3127_v20 }
 0x211   : > { %v997_v27 = vadd.f32 0.4994258, %v996_v35  ;;  %v1303_v18 = vmul.f32 %v1302_v23, %v3093_v53  ;;  %v1542_v56 = vadd.f32 1.0, %v1902_v52  ;;  %v1442_v8 = vsub.f32 1.0, %v1441_v22 }
 0x212   : > { %vm1446_vm4 = vweird.f32 %v2039_v5  ;;  %v1451_v55 = vand.u32 2147483648, %v3109_v63  ;;  %v986_v25 = vadd.f32 0.18741608, %v985_v34  ;;  %v1314_v13 = vmul.f32 %v1313_v4, %v3093_v53 }
 0x213   : > { %v998_v16 = vmul.f32 %v997_v27, %v3085_v41  ;;  %v3145_v21 = vmin.f32 %v1457_v43, 16.0  ;;  %v1558_v28 = vmul.f32 %v1542_v56, %v870_v2  ;;  %v1443_v26 = vmul.f32 %v2039_v5, %v1442_v8 }
 0x214   : > { %v1304_v42 = vadd.f32 0.05243302, %v1303_v18  ;;  %v3148_v3 = vmul.f32 0.70710677, %v3137_v1  ;;  %vm1445_vm0 = vweird.f32 %v3109_v63  ;;  %v1315_v40 = vadd.f32 0.112945676, %v1314_v13 }
 0x215   : > { %v3151_v60 = vadd.f32 1.0, %v998_v16  ;;  %v1459_v0 = vmul.f32 2.1237322e-06, %v3145_v21  ;;  %1575 = vst.msk [vmem:[%s2896_s20 + $0x28] sm:$0xff] %vm1569_vm8, %v1558_v28  ;;  %v1444_v44 = vadd.f32 %v2039_v5, %v1443_v26  ;;  %vm1450_vm5 = vcmp.eq.f32.partialorder %v1449_v31, 8.507059e+37  ;;  %vm1447_vm6 = vmor %vm1445_vm0, %vm1446_vm4 }
 0x216   : > { %v1452_v61 = vor.u32 1.1754944e-38, %v1451_v55  ;;  %v1470_v14 = vmul.f32 3.8918573e-05, %v3145_v21  ;;  %v987_v49 = vmul.f32 %v986_v25, %v3085_v41  ;;  %v1137_v63 = vmul.f32 %v3148_v3, %v3148_v3 }
 0x217   : > { %2040 = vrcp.f32 %v3151_v60  ;;  %v3163_v57 = vadd.f32 %v2809_v33, %v850_v59  ;;  %v1448_v32 = vsel %vm1447_vm6, %v2039_v5, %v1444_v44  ;;  %v1305_v46 = vmul.f32 %v1304_v42, %v3093_v53 }
 0x218   : > { %v1316_v37 = vmul.f32 %v1315_v40, %v3093_v53  ;;  %v1460_v45 = vadd.f32 0.00028619796, %v1459_v0  ;;  %v3169_v47 = vsel %vm1687_vm3, %v2906_v36, 0.0  ;;  %v878_v41 = vmul.f32 0.5, %v2970_v54 }
 0x219   : > { %v1453_v12 = vsel %vm1450_vm5, %v1452_v61, %v1448_v32  ;;  %v1471_v10 = vadd.f32 0.001143296, %v1470_v14  ;;  %v3173_v11 = vmul.f32 0.5, %v3041_v39  ;;  %v988_v17 = vadd.f32 1.1283791, %v987_v49 }
 0x21a   : > { %v1454_v15 = vmul.f32 %v1453_v12, %v1429_v6  ;;  %v1317_v33 = vadd.f32 0.4994258, %v1316_v37  ;;  %v1461_v24 = vmul.f32 %v1460_v45, %v3145_v21  ;;  %v3177_v50 = vmin.f32 %v1137_v63, 16.0 }
 0x21b   : > { %v1472_v51 = vmul.f32 %v1471_v10, %v3145_v21  ;;  %v3180_v48 = vmul.f32 0.70710677, %v3163_v57  ;;  %v1306_v19 = vadd.f32 0.18741608, %v1305_v46  ;;  %v1009_v35 = vand.u32 2147483647, %v3151_v60 }
 0x21c   : > { %v1910_v36 = vclamps-f32 %v1454_v15, 1.0  ;;  %v1318_v54 = vmul.f32 %v1317_v33, %v3093_v53  ;;  %v1462_v7 = vadd.f32 0.0036580483, %v1461_v24  ;;  %v1139_v39 = vmul.f32 2.1237322e-06, %v3177_v50 }
 0x21d   : > { %v2041_v2 = vpop.eup %2040  ;;  %v1473_v9 = vadd.f32 0.014752088, %v1472_v51  ;;  %v1150_v62 = vmul.f32 3.8918573e-05, %v3177_v50  ;;  %v1337_v5 = vmul.f32 %v3180_v48, %v3180_v48  ;;  %v1011_v23 = vand.u32 2147483648, %v3151_v60 }
 0x21e   : > { %v1550_v6 = vadd.f32 1.0, %v1910_v36  ;;  %v1001_v34 = vmul.f32 %v2041_v2, %v3151_v60  ;;  %v3190_v52 = vadd.f32 1.0, %v1318_v54  ;;  %v1463_v22 = vmul.f32 %v1462_v7, %v3145_v21 }
 0x21f   : > { %v1474_v31 = vmul.f32 %v1473_v9, %v3145_v21  ;;  %v1140_v27 = vadd.f32 0.00028619796, %v1139_v39  ;;  %v1151_v43 = vadd.f32 0.001143296, %v1150_v62  ;;  %v3194_v56 = vmin.f32 %v1337_v5, 16.0  ;;  %v862_v62 = vpop.f32.mrf.mxu3 }
 0x220   : > { %v1566_v18 = vmul.f32 %v1550_v6, %v878_v41  ;;  %v1002_v4 = vsub.f32 1.0, %v1001_v34  ;;  %vm1005_vm7 = vweird.f32 %v3151_v60  ;;  %vm1006_vm9 = vweird.f32 %v2041_v2 }
 0x221   : > { %v1307_v8 = vmul.f32 %v1306_v19, %v3093_v53  ;;  %2042 = vrcp.f32 %v3190_v52  ;;  %v1464_v25 = vadd.f32 0.05243302, %v1463_v22  ;;  %v1475_v16 = vadd.f32 0.112945676, %v1474_v31  ;;  %vm1007_vm11 = vmor %vm1005_vm7, %vm1006_vm9 }
 0x222   : > { %1583 = vst.msk [vmem:[%s2896_s20 + $0x68] sm:$0xff] %vm1569_vm8, %v1566_v18  ;;  %v1003_v55 = vmul.f32 %v2041_v2, %v1002_v4  ;;  %v1141_v13 = vmul.f32 %v1140_v27, %v3177_v50  ;;  %vm3202_vm10 = vcmp.eq.f32.partialorder %v1009_v35, 8.507059e+37  ;;  %v1012_v26 = vor.u32 1.1754944e-38, %v1011_v23  ;;  %v3236_v18 = vld [vmem:[%s3422_s4] ss:$0 sm:$0xff] }
 0x223   : > { %v1152_v42 = vmul.f32 %v1151_v43, %v3177_v50  ;;  %v1339_v59 = vmul.f32 2.1237322e-06, %v3194_v56  ;;  %v1465_v53 = vmul.f32 %v1464_v25, %v3145_v21  ;;  %v1476_v0 = vmul.f32 %v1475_v16, %v3145_v21 }
 0x224   : > { %v1004_v40 = vadd.f32 %v2041_v2, %v1003_v55  ;;  %v1142_v44 = vadd.f32 0.0036580483, %v1141_v13  ;;  %v989_v61 = vmul.f32 %v988_v17, %v3056_v38  ;;  %v1350_v63 = vmul.f32 3.8918573e-05, %v3194_v56 }
 0x225   : > { %v1153_v14 = vadd.f32 0.014752088, %v1152_v42  ;;  %v1340_v49 = vadd.f32 0.00028619796, %v1339_v59  ;;  %v1308_v46 = vadd.f32 1.1283791, %v1307_v8  ;;  %vm1325_vm13 = vweird.f32 %v3190_v52 }
 0x226   : > { %v1008_v32 = vsel %vm1007_vm11, %v2041_v2, %v1004_v40  ;;  %v1477_v37 = vadd.f32 0.4994258, %v1476_v0  ;;  %v1143_v45 = vmul.f32 %v1142_v44, %v3177_v50  ;;  %v1351_v15 = vadd.f32 0.001143296, %v1350_v63 }
 0x227   : > { %v2043_v41 = vpop.eup %2042  ;;  %v1013_v12 = vsel %vm3202_vm10, %v1012_v26, %v1008_v32  ;;  %v1154_v10 = vmul.f32 %v1153_v14, %v3177_v50  ;;  %v1341_v38 = vmul.f32 %v1340_v49, %v3194_v56  ;;  %v1329_v24 = vand.u32 2147483647, %v3190_v52 }
 0x228   : > { %v1014_v60 = vmul.f32 %v1013_v12, %v989_v61  ;;  %v1321_v33 = vmul.f32 %v2043_v41, %v3190_v52  ;;  %v1466_v17 = vadd.f32 0.18741608, %v1465_v53  ;;  %v1331_v51 = vand.u32 2147483648, %v3190_v52  ;;  %v838_v61 = vpop.f32.mrf.mxu1 }
 0x229   : > { %v1478_v36 = vmul.f32 %v1477_v37, %v3145_v21  ;;  %v1144_v19 = vadd.f32 0.05243302, %v1143_v45  ;;  %v1155_v54 = vadd.f32 0.112945676, %v1154_v10  ;;  %v1342_v9 = vadd.f32 0.0036580483, %v1341_v38 }
 0x22a   : > { %v1899_v7 = vclamps-f32 %v1014_v60, 1.0  ;;  %v1322_v2 = vsub.f32 1.0, %v1321_v33  ;;  %v1352_v39 = vmul.f32 %v1351_v15, %v3194_v56  ;;  %vm1326_vm12 = vweird.f32 %v2043_v41 }
 0x22b   : > { %v3225_v5 = vadd.f32 1.0, %v1478_v36  ;;  %v1145_v6 = vmul.f32 %v1144_v19, %v3177_v50  ;;  %v1156_v34 = vmul.f32 %v1155_v54, %v3177_v50  ;;  %v1467_v22 = vmul.f32 %v1466_v17, %v3145_v21  ;;  %vm1327_vm14 = vmor %vm1325_vm13, %vm1326_vm12 }
 0x22c   : > { %v1539_v35 = vadd.f32 1.0, %v1899_v7  ;;  %v1323_v23 = vmul.f32 %v2043_v41, %v1322_v2  ;;  %v1353_v31 = vadd.f32 0.014752088, %v1352_v39  ;;  %v1719_v27 = vrot.slane %v3169_v47, 4 }
 0x22d   : > { %2044 = vrcp.f32 %v3225_v5  ;;  %v3239_v4 = vadd.f32 %v3236_v18, %v862_v62  ;;  %v1157_v21 = vadd.f32 0.4994258, %v1156_v34  ;;  %v1343_v55 = vmul.f32 %v1342_v9, %v3194_v56 }
 0x22e   : > { %v1555_v43 = vmul.f32 %v1539_v35, %v3173_v11  ;;  %v1324_v8 = vadd.f32 %v2043_v41, %v1323_v23  ;;  %v1309_v25 = vmul.f32 %v1308_v46, %v3072_v58  ;;  %v1332_v52 = vor.u32 1.1754944e-38, %v1331_v51 }
 0x22f   : > { %v1146_v16 = vadd.f32 0.18741608, %v1145_v6  ;;  %v1354_v13 = vmul.f32 %v1353_v31, %v3194_v56  ;;  %vm1330_vm15 = vcmp.eq.f32.partialorder %v1329_v24, 8.507059e+37  ;;  %v1468_v26 = vadd.f32 1.1283791, %v1467_v22 }
 0x230   : > { %1572 = vst.msk [vmem:[%s2896_s20 + $0x10] sm:$0xff] %vm1569_vm8, %v1555_v43  ;;  %v1328_v28 = vsel %vm1327_vm14, %v2043_v41, %v1324_v8  ;;  %v1158_v42 = vmul.f32 %v1157_v21, %v3177_v50  ;;  %v1720_v11 = vadd.f32 %v1719_v27, %v3169_v47  ;;  %v3251_v53 = vmul.f32 0.70710677, %v3239_v4 }
 0x231   : > { %v1333_v59 = vsel %vm1330_vm15, %v1332_v52, %v1328_v28  ;;  %v1355_v40 = vadd.f32 0.112945676, %v1354_v13  ;;  %v1344_v44 = vadd.f32 0.05243302, %v1343_v55  ;;  %v875_v49 = vmul.f32 0.5, %v3059_v29 }
 0x232   : > { %v1334_v58 = vmul.f32 %v1333_v59, %v1309_v25  ;;  %v3253_v0 = vadd.f32 1.0, %v1158_v42  ;;  %v1147_v63 = vmul.f32 %v1146_v16, %v3177_v50  ;;  %v1497_v47 = vmul.f32 %v3251_v53, %v3251_v53 }
 0x233   : > { %v2045_v14 = vpop.eup %2044  ;;  %v1356_v32 = vmul.f32 %v1355_v40, %v3194_v56  ;;  %v3261_v37 = vmul.f32 0.5, %v3116_v30  ;;  %v1469_v45 = vmul.f32 %v1468_v26, %v3127_v20  ;;  %v1491_v12 = vand.u32 2147483648, %v3225_v5 }
 0x234   : > { %v1907_v46 = vclamps-f32 %v1334_v58, 1.0  ;;  %v1481_v41 = vmul.f32 %v2045_v14, %v3225_v5  ;;  %2046 = vrcp.f32 %v3253_v0  ;;  %v3268_v29 = vadd.f32 %v3236_v18, %v838_v61 }
 0x235   : > { %v1721_v50 = vrot.slane %v1720_v11, 2  ;;  %v1345_v15 = vmul.f32 %v1344_v44, %v3194_v56  ;;  %v1357_v60 = vadd.f32 0.4994258, %v1356_v32  ;;  %vm1485_vm1 = vweird.f32 %v3225_v5 }
 0x236   : > { %v1547_v10 = vadd.f32 1.0, %v1907_v46  ;;  %v1482_v38 = vsub.f32 1.0, %v1481_v41  ;;  %v1489_v30 = vand.u32 2147483647, %v3225_v5  ;;  %v1148_v20 = vadd.f32 1.1283791, %v1147_v63 }
 0x237   : > { %v3273_v33 = vmin.f32 %v1497_v47, 16.0  ;;  %vm1486_vm2 = vweird.f32 %v2045_v14  ;;  %v1358_v51 = vmul.f32 %v1357_v60, %v3194_v56  ;;  %v3279_v54 = vmul.f32 0.70710677, %v3268_v29 }
 0x238   : > { %v1563_v24 = vmul.f32 %v1547_v10, %v875_v49  ;;  %v1483_v17 = vmul.f32 %v2045_v14, %v1482_v38  ;;  %v1722_v7 = vadd.f32 %v1721_v50, %v1720_v11  ;;  %v1492_v9 = vor.u32 1.1754944e-38, %v1491_v12  ;;  %vm1487_vm3 = vmor %vm1485_vm1, %vm1486_vm2 }
 0x239   : > { %v1499_v36 = vmul.f32 2.1237322e-06, %v3273_v33  ;;  %v1510_v19 = vmul.f32 3.8918573e-05, %v3273_v33  ;;  %v1346_v39 = vadd.f32 0.18741608, %v1345_v15  ;;  %v1177_v23 = vmul.f32 %v3279_v54, %v3279_v54 }
 0x23a   : > { %1580 = vst.msk [vmem:[%s2896_s20 + $0x50] sm:$0xff] %vm1569_vm8, %v1563_v24  ;;  %v1484_v2 = vadd.f32 %v2045_v14, %v1483_v17  ;;  %v3283_v62 = vadd.f32 1.0, %v1358_v51  ;;  %v2047_v6 = vpop.eup %2046  ;;  %v1723_v22 = vrot.slane %v1722_v7, 1  ;;  %vm1490_vm4 = vcmp.eq.f32.partialorder %v1489_v30, 8.507059e+37 }
 0x23b   : > { %v1500_v34 = vadd.f32 0.00028619796, %v1499_v36  ;;  %v1511_v35 = vadd.f32 0.001143296, %v1510_v19  ;;  %v1161_v27 = vmul.f32 %v2047_v6, %v3253_v0  ;;  %v1149_v8 = vmul.f32 %v1148_v20, %v3148_v3 }
 0x23c   : > { %v1488_v31 = vsel %vm1487_vm3, %v2045_v14, %v1484_v2  ;;  %2048 = vrcp.f32 %v3283_v62  ;;  %v1169_v21 = vand.u32 2147483647, %v3253_v0  ;;  %v1171_v5 = vand.u32 2147483648, %v3253_v0 }
 0x23d   : > { %v1493_v43 = vsel %vm1490_vm4, %v1492_v9, %v1488_v31  ;;  %v1162_v25 = vsub.f32 1.0, %v1161_v27  ;;  %v1501_v52 = vmul.f32 %v1500_v34, %v3273_v33  ;;  %v1512_v16 = vmul.f32 %v1511_v35, %v3273_v33 }
 0x23e   : > { %v1494_v55 = vmul.f32 %v1493_v43, %v1469_v45  ;;  %vm1166_vm0 = vweird.f32 %v2047_v6  ;;  %v1347_v13 = vmul.f32 %v1346_v39, %v3194_v56  ;;  %v3297_v28 = vmin.f32 %v1177_v23, 16.0 }
 0x23f   : > { %v1724_v26 = vadd.f32 %v1723_v22, %v1722_v7  ;;  %v1163_v11 = vmul.f32 %v2047_v6, %v1162_v25  ;;  %v1502_v59 = vadd.f32 0.0036580483, %v1501_v52  ;;  %v1513_v3 = vadd.f32 0.014752088, %v1512_v16 }
 0x240   : > { %v1911_v42 = vclamps-f32 %v1494_v55, 1.0  ;;  %vm1165_vm5 = vweird.f32 %v3253_v0  ;;  %vm3300_vm6 = vcmp.eq.f32.partialorder %v1169_v21, 8.507059e+37  ;;  %v1179_v58 = vmul.f32 2.1237322e-06, %v3297_v28 }
 0x241   : > { %v1190_v44 = vmul.f32 3.8918573e-05, %v3297_v28  ;;  %1726 = vrot.lane.b32.xlu2 %v1724_v26, %s2138_s27  ;;  %v1164_v14 = vadd.f32 %v2047_v6, %v1163_v11  ;;  %v1172_v49 = vor.u32 1.1754944e-38, %v1171_v5  ;;  %v1514_v63 = vmul.f32 %v1513_v3, %v3273_v33  ;;  %vm1167_vm7 = vmor %vm1165_vm5, %vm1166_vm0 }
 0x242   : > { %v2049_v56 = vpop.eup %2048  ;;  %v1551_v61 = vadd.f32 1.0, %v1911_v42  ;;  %v1348_v0 = vadd.f32 1.1283791, %v1347_v13  ;;  %v1180_v47 = vadd.f32 0.00028619796, %v1179_v58  ;;  %v1503_v12 = vmul.f32 %v1502_v59, %v3273_v33 }
 0x243   : > { %v1361_v32 = vmul.f32 %v2049_v56, %v3283_v62  ;;  %v1191_v46 = vadd.f32 0.001143296, %v1190_v44  ;;  %v1168_v41 = vsel %vm1167_vm7, %v2047_v6, %v1164_v14  ;;  %v1515_v50 = vadd.f32 0.112945676, %v1514_v63 }
 0x244   : > { %v1567_v45 = vmul.f32 %v1551_v61, %v3261_v37  ;;  %v1173_v10 = vsel %vm3300_vm6, %v1172_v49, %v1168_v41  ;;  %v1181_v15 = vmul.f32 %v1180_v47, %v3297_v28  ;;  %v1369_v20 = vand.u32 2147483647, %v3283_v62 }
 0x245   : > { %v1362_v38 = vsub.f32 1.0, %v1361_v32  ;;  %v1192_v60 = vmul.f32 %v1191_v46, %v3297_v28  ;;  %v1174_v30 = vmul.f32 %v1173_v10, %v1149_v8  ;;  %v1371_v24 = vand.u32 2147483648, %v3283_v62 }
 0x246   : > { %1584 = vst.msk [vmem:[%s2896_s20 + $0x70] sm:$0xff] %vm1569_vm8, %v1567_v45  ;;  %v1516_v37 = vmul.f32 %v1515_v50, %v3273_v33  ;;  %vm1366_vm9 = vweird.f32 %v2049_v56  ;;  %v1182_v51 = vadd.f32 0.0036580483, %v1181_v15  ;;  %v871_v19 = vmul.f32 0.5, %v3137_v1 }
 0x247   : > { %v1363_v17 = vmul.f32 %v2049_v56, %v1362_v38  ;;  %v1193_v36 = vadd.f32 0.014752088, %v1192_v60  ;;  %v1903_v7 = vclamps-f32 %v1174_v30, 1.0  ;;  %vm1365_vm10 = vweird.f32 %v3283_v62 }
 0x248   : > { %v1517_v2 = vadd.f32 0.4994258, %v1516_v37  ;;  %v1504_v39 = vadd.f32 0.05243302, %v1503_v12  ;;  %v1349_v35 = vmul.f32 %v1348_v0, %v3180_v48  ;;  %vm1367_vm11 = vmor %vm1365_vm10, %vm1366_vm9  ;;  %v1372_v23 = vor.u32 1.1754944e-38, %v1371_v24  ;;  %v826_v48 = vpop.f32.mrf.mxu0 }
 0x249   : > { %v1364_v9 = vadd.f32 %v2049_v56, %v1363_v17  ;;  %v1194_v6 = vmul.f32 %v1193_v36, %v3297_v28  ;;  %v1543_v34 = vadd.f32 1.0, %v1903_v7  ;;  %vm1370_vm12 = vcmp.eq.f32.partialorder %v1369_v20, 8.507059e+37 }
 0x24a   : > { %v1518_v22 = vmul.f32 %v1517_v2, %v3273_v33  ;;  %v1183_v1 = vmul.f32 %v1182_v51, %v3297_v28  ;;  %v1505_v5 = vmul.f32 %v1504_v39, %v3273_v33  ;;  %v3331_v13 = vadd.f32 %v3236_v18, %v826_v48 }
 0x24b   : > { %v1368_v31 = vsel %vm1367_vm11, %v2049_v56, %v1364_v9  ;;  %v1195_v27 = vadd.f32 0.112945676, %v1194_v6  ;;  %v1559_v43 = vmul.f32 %v1543_v34, %v871_v19  ;;  %v876_v26 = vmul.f32 0.5, %v3163_v57 }
 0x24c   : > { %v1373_v8 = vsel %vm1370_vm12, %v1372_v23, %v1368_v31  ;;  %v1519_v21 = vadd.f32 1.0, %v1518_v22  ;;  %v1184_v52 = vadd.f32 0.05243302, %v1183_v1  ;;  %v1506_v11 = vadd.f32 0.18741608, %v1505_v5 }
 0x24d   : > { %v1374_v62 = vmul.f32 %v1373_v8, %v1349_v35  ;;  %v1196_v55 = vmul.f32 %v1195_v27, %v3297_v28  ;;  %1576 = vst.msk [vmem:[%s2896_s20 + $0x30] sm:$0xff] %vm1569_vm8, %v1559_v43  ;;  %v3336_v3 = vmul.f32 0.70710677, %v3331_v13  ;;  %v880_v23 = vmul.f32 0.5, %v3239_v4 }
 0x24e   : > { %2050 = vrcp.f32 %v1519_v21  ;;  %v1185_v58 = vmul.f32 %v1184_v52, %v3297_v28  ;;  %v1507_v18 = vmul.f32 %v1506_v11, %v3273_v33  ;;  %v1531_v0 = vand.u32 2147483648, %v1519_v21 }
 0x24f   : > { %v1908_v25 = vclamps-f32 %v1374_v62, 1.0  ;;  %v1197_v16 = vadd.f32 0.4994258, %v1196_v55  ;;  %v1017_v61 = vmul.f32 %v3336_v3, %v3336_v3  ;;  %v1529_v41 = vand.u32 2147483647, %v1519_v21 }
 0x250   : > { %v1186_v63 = vadd.f32 0.18741608, %v1185_v58  ;;  %v1508_v46 = vadd.f32 1.1283791, %v1507_v18  ;;  %vm1525_vm14 = vweird.f32 %v1519_v21  ;;  %v1532_v15 = vor.u32 1.1754944e-38, %v1531_v0 }
 0x251   : > { %v1548_v42 = vadd.f32 1.0, %v1908_v25  ;;  %v1198_v59 = vmul.f32 %v1197_v16, %v3297_v28  ;;  %v3344_v14 = vmin.f32 %v1017_v61, 16.0  ;;  %vm1530_vm1 = vcmp.eq.f32.partialorder %v1529_v41, 8.507059e+37 }
 0x252   : > { %v1187_v33 = vmul.f32 %v1186_v63, %v3297_v28  ;;  %v1509_v24 = vmul.f32 %v1508_v46, %v3251_v53  ;;  %vm326_vm5 = vcmask 122880   ;;  %v2139_v4 = vmov 0.0  }
 0x253   : > { %v1564_v40 = vmul.f32 %v1548_v42, %v876_v26  ;;  %v1199_v44 = vadd.f32 1.0, %v1198_v59  ;;  %v1019_v32 = vmul.f32 2.1237322e-06, %v3344_v14  ;;  %v1030_v47 = vmul.f32 3.8918573e-05, %v3344_v14 }
 0x254   : > { %v2051_v56 = vpop.eup %2050  ;;  %v1188_v7 = vadd.f32 1.1283791, %v1187_v33  ;;  %327 = vst.msk [vmem:[%s3360_s30] sm:$0x1] %vm326_vm5, %v2139_v4  ;;  %v872_v52 = vmul.f32 0.5, %v3268_v29 }
 0x255   : > { %1581 = vst.msk [vmem:[%s2896_s20 + $0x58] sm:$0xff] %vm1569_vm8, %v1564_v40  ;;  %v1521_v57 = vmul.f32 %v2051_v56, %v1519_v21  ;;  %2052 = vrcp.f32 %v1199_v44  ;;  %vm1526_vm13 = vweird.f32 %v2051_v56  ;;  %v1020_v12 = vadd.f32 0.00028619796, %v1019_v32 }
 0x256   : > { %v1031_v50 = vadd.f32 0.001143296, %v1030_v47  ;;  %vm1527_vm15 = vmor %vm1525_vm14, %vm1526_vm13  ;;  %v1211_v2 = vand.u32 2147483648, %v1199_v44  ;;  %v1209_v39 = vand.u32 2147483647, %v1199_v44  ;;  %vm1205_vm3 = vweird.f32 %v1199_v44 }
 0x257   : > { %v1522_v49 = vsub.f32 1.0, %v1521_v57  ;;  %v1021_v30 = vmul.f32 %v1020_v12, %v3344_v14  ;;  %v1189_v27 = vmul.f32 %v1188_v7, %v3279_v54 }
 0x258   : > { %v1032_v20 = vmul.f32 %v1031_v50, %v3344_v14  ;;  %v1212_v31 = vor.u32 1.1754944e-38, %v1211_v2  ;;  %vm1210_vm0 = vcmp.eq.f32.partialorder %v1209_v39, 8.507059e+37 }
 0x259   : > { %v1523_v45 = vmul.f32 %v2051_v56, %v1522_v49  ;;  %v1022_v9 = vadd.f32 0.0036580483, %v1021_v30 }
 0x25a   : > { %v1033_v36 = vadd.f32 0.014752088, %v1032_v20 }
 0x25b   : > { %v2053_v10 = vpop.eup %2052  ;;  %v1524_v38 = vadd.f32 %v2051_v56, %v1523_v45  ;;  %v1023_v1 = vmul.f32 %v1022_v9, %v3344_v14  ;;  %v868_v45 = vmul.f32 0.5, %v3331_v13  ;;  %v1686_v50 = vld [vmem:[%s3360_s30] sm:$0x1] }
 0x25c   : > { %v1201_v60 = vmul.f32 %v2053_v10, %v1199_v44  ;;  %vm1206_vm2 = vweird.f32 %v2053_v10  ;;  %v1034_v6 = vmul.f32 %v1033_v36, %v3344_v14 }
 0x25d   : > { %v1528_v37 = vsel %vm1527_vm15, %v2051_v56, %v1524_v38  ;;  %vm1207_vm4 = vmor %vm1205_vm3, %vm1206_vm2  ;;  %v1024_v54 = vadd.f32 0.05243302, %v1023_v1 }
 0x25e   : > { %v1533_v17 = vsel %vm1530_vm1, %v1532_v15, %v1528_v37  ;;  %v1202_v51 = vsub.f32 1.0, %v1201_v60  ;;  %v1035_v53 = vadd.f32 0.112945676, %v1034_v6 }
 0x25f   : > { %v1534_v19 = vmul.f32 %v1533_v17, %v1509_v24  ;;  %v1025_v42 = vmul.f32 %v1024_v54, %v3344_v14 }
 0x260   : > { %v1203_v28 = vmul.f32 %v2053_v10, %v1202_v51  ;;  %v1036_v8 = vmul.f32 %v1035_v53, %v3344_v14 }
 0x261   : > { %v1912_v34 = vclamps-f32 %v1534_v19, 1.0  ;;  %v1026_v59 = vadd.f32 0.18741608, %v1025_v42 }
 0x262   : > { %v1204_v35 = vadd.f32 %v2053_v10, %v1203_v28  ;;  %v1037_v55 = vadd.f32 0.4994258, %v1036_v8 }
 0x263   : > { %v1552_v22 = vadd.f32 1.0, %v1912_v34  ;;  %v1027_v58 = vmul.f32 %v1026_v59, %v3344_v14 }
 0x264   : > { %v1208_v43 = vsel %vm1207_vm4, %v2053_v10, %v1204_v35  ;;  %v1038_v25 = vmul.f32 %v1037_v55, %v3344_v14 }
 0x265   : > { %v1568_v21 = vmul.f32 %v1552_v22, %v880_v23  ;;  %v1213_v62 = vsel %vm1210_vm0, %v1212_v31, %v1208_v43  ;;  %v1028_v18 = vadd.f32 1.1283791, %v1027_v58 }
 0x266   : > { %v1214_v5 = vmul.f32 %v1213_v62, %v1189_v27  ;;  %v1039_v26 = vadd.f32 1.0, %v1038_v25 }
 0x267   : > { %1585 = vst.msk [vmem:[%s2896_s20 + $0x78] sm:$0xff] %vm1569_vm8, %v1568_v21  ;;  %v1029_v0 = vmul.f32 %v1028_v18, %v3336_v3 }
 0x268   : > { %v1904_v48 = vclamps-f32 %v1214_v5, 1.0  ;;  %2054 = vrcp.f32 %v1039_v26  ;;  %v1051_v61 = vand.u32 2147483648, %v1039_v26  ;;  %v1049_v29 = vand.u32 2147483647, %v1039_v26 }
 0x269   : > { %vm1045_vm7 = vweird.f32 %v1039_v26 }
 0x26a   : > { %v1544_v16 = vadd.f32 1.0, %v1904_v48  ;;  %v1052_v63 = vor.u32 1.1754944e-38, %v1051_v61  ;;  %vm1050_vm10 = vcmp.eq.f32.partialorder %v1049_v29, 8.507059e+37 }
 0x26c   : > { %v1560_v11 = vmul.f32 %v1544_v16, %v872_v52 }
 0x26e   : > { %1577 = vst.msk [vmem:[%s2896_s20 + $0x38] sm:$0xff] %vm1569_vm8, %v1560_v11  ;;  %v2055_v40 = vpop.eup %2054 }
 0x26f   : > { %v1041_v44 = vmul.f32 %v2055_v40, %v1039_v26  ;;  %vm1046_vm6 = vweird.f32 %v2055_v40 }
 0x270   : > { %vm1047_vm9 = vmor %vm1045_vm7, %vm1046_vm6 }
 0x271   : > { %v1042_v56 = vsub.f32 1.0, %v1041_v44 }
 0x273   : > { %v1043_v57 = vmul.f32 %v2055_v40, %v1042_v56 }
 0x275   : > { %v1044_v49 = vadd.f32 %v2055_v40, %v1043_v57 }
 0x277   : > { %v1048_v32 = vsel %vm1047_vm9, %v2055_v40, %v1044_v49 }
 0x278   : > { %v1053_v14 = vsel %vm1050_vm10, %v1052_v63, %v1048_v32 }
 0x279   : > { %v1054_v47 = vmul.f32 %v1053_v14, %v1029_v0 }
 0x27b   : > { %v1900_v46 = vclamps-f32 %v1054_v47, 1.0 }
 0x27d   : > { %v1540_v41 = vadd.f32 1.0, %v1900_v46 }
 0x27f   : > { %v1556_v12 = vmul.f32 %v1540_v41, %v868_v45 }
 0x281   : > { %1573 = vst.msk [vmem:[%s2896_s20 + $0x18] sm:$0xff] %vm1569_vm8, %v1556_v12 }
 0x29b   : > { %v1727_v3 = vpop.permute.xlu2 %1726 }
 0x29c   : > { %v1729_v10 = vadd.f32 %v1727_v3, %v1686_v50 }
 0x29e   : > { %1731 = vst.msk [vmem:[%s3360_s30] sm:$0x1] %vm326_vm5, %v1729_v10 }
 0x29f   : > { %2084 = shalt.err (!%p2081_p5)
}
 0x2a0   : > { %1929 = dma.vmem_to_hbm [thread:$0]  (%p2215_p4), %s1760_s15, 16, %s1762_s16, %s1743_s17  }
 0x2a1 PF: > { %p1935_p6 = scmp.ge.s32.totalorder %s2135_s26, 2  ;;  %s1786_s28 = sand.u32 1, %s2115_s21  }
 0x2a2   : > { %s1787_s30 = scalar_lea.sflag [#allocation3], %s1786_s28 }
 0x2a3   : > { %p1932_p7 = pnand %p1935_p6, %p2222_p8 }
 0x2a5   : > { %p1933_p9 = pneg %p1932_p7 }
 0x2a7   : > { %2110 = dma.done.wait (%p1933_p9), %s1787_s30, 16  }
 0x2a8   : > { %2112 = vsyncadd (%p1933_p9), %s1787_s30, 4294967280  ;;  %s20_s26 = sadd.s32 1, %s2135_s26   ;;  %s3467_s21 = smov %s2119_s22 }
 0x2a9   : > { %p17_p10 = scmp.ge.s32.totalorder %s20_s26, 4   ;;  %s3468_s22 = smov %s2123_s23 }
 0x2aa   : > { %s3469_s23 = smov %s2228_s10  ;;  %s3470_s24 = smov %s2131_s25 }
 0x2ab   : > { %s3471_s25 = smov %s3473_s29  ;;  %19 = sbr.rel (!%p17_p10) target bundleno = 4 (0x4), region = 91 }
 0x2b0   :  { %1792 = vsyncpa [#allocation3], 1 }
 0x2b1   :  { %1794 = vsyncpa [#allocation3 + $0x1], 1 }

</bundles_post_ra>
